<compile_context>
chip_gen: v7x
topology: tpu7x:2x2x1
jax: 0.10.0
libtpu: 0.0.40
codegen_flags: <defaults>
</compile_context>

<pallas_src>
import math

import jax
import jax.numpy as jnp
from jax import lax
from jax.experimental import pallas as pl
from jax.experimental.pallas import tpu as pltpu

# ----------------------------- model config ---------------------------------
B = 2        # batch
S = 8        # sequence length
D = 32       # d_model  (layer.size)
H = 4        # attention heads
DH = D // H  # head dim
DFF = 64     # feed-forward hidden dim
N_LAYERS = 2 # Encoder depth
EPS = 1e-5   # torch.nn.LayerNorm default

# Row layout of the packed (8, D) vector table.
(ROW_BO, ROW_LN1_G, ROW_LN1_B, ROW_LN2_G, ROW_LN2_B,
 ROW_B2, ROW_NORM_G, ROW_NORM_B) = range(8)


def _layernorm(x, g, b, eps=EPS):
    # x: (rows, D) fp32, g/b: (1, D) -- matches nn.LayerNorm (biased variance)
    mu = jnp.mean(x, axis=-1, keepdims=True)
    var = jnp.mean((x - mu) ** 2, axis=-1, keepdims=True)
    return (x - mu) * lax.rsqrt(var + eps) * g + b


# ---------------------- fully fused encoder kernel --------------------------
def encoder_kernel(x_ref, mask_ref,
                   wqkv_ref, bqkv_ref, wo_ref, w1_ref, b1_ref, w2_ref,
                   vec_ref, o_ref):
    x = x_ref[0].astype(jnp.float32)              # (S, D)
    mask_row = mask_ref[0]                        # (1, S); 0 => masked key
    # Hoisted once for the whole kernel (not re-emitted per head / per layer).
    mask_bias = jnp.where(mask_row == 0.0, -1e9, 0.0)   # (1, S)

    # Load all (shared, deep-copied) layer weights once.
    wqkv = wqkv_ref[...]                          # (D, 3D), Wq pre-scaled by 1/sqrt(DH)
    bqkv = bqkv_ref[...]                          # (1, 3D), bq pre-scaled
    wo = wo_ref[...]                              # (D, D)
    w1 = w1_ref[...]                              # (D, DFF)
    b1 = b1_ref[...]                              # (1, DFF)
    w2 = w2_ref[...]                              # (DFF, D)
    bo = vec_ref[ROW_BO:ROW_BO + 1, :]            # (1, D)
    ln1_g = vec_ref[ROW_LN1_G:ROW_LN1_G + 1, :]
    ln1_b = vec_ref[ROW_LN1_B:ROW_LN1_B + 1, :]
    ln2_g = vec_ref[ROW_LN2_G:ROW_LN2_G + 1, :]
    ln2_b = vec_ref[ROW_LN2_B:ROW_LN2_B + 1, :]
    b2 = vec_ref[ROW_B2:ROW_B2 + 1, :]
    norm_g = vec_ref[ROW_NORM_G:ROW_NORM_G + 1, :]
    norm_b = vec_ref[ROW_NORM_B:ROW_NORM_B + 1, :]

    for _ in range(N_LAYERS):                     # layers share params (deepcopy)
        # ---- sublayer 1: pre-norm multi-head self-attention + residual ----
        h = _layernorm(x, ln1_g, ln1_b)
        qkv = jnp.dot(h, wqkv, preferred_element_type=jnp.float32) + bqkv   # (S, 3D)

        acc = jnp.zeros((S, D), jnp.float32)
        for hd in range(H):                       # static unrolled head loop
            q = qkv[:, hd * DH:(hd + 1) * DH]                 # (S, DH), pre-scaled
            k = qkv[:, D + hd * DH:D + (hd + 1) * DH]         # (S, DH)
            v = qkv[:, 2 * D + hd * DH:2 * D + (hd + 1) * DH] # (S, DH)
            # q @ k^T without an explicit transpose.
            s = lax.dot_general(q, k, (((1,), (1,)), ((), ())),
                                preferred_element_type=jnp.float32)         # (S, S)
            s = s + mask_bias
            s = s - jnp.max(s, axis=-1, keepdims=True)
            p = jnp.exp(s)
            p = p * pl.reciprocal(jnp.sum(p, axis=-1, keepdims=True), approx=True)
            ho = jnp.dot(p, v, preferred_element_type=jnp.float32)          # (S, DH)
            # Fold the output projection into the head loop (no concatenate).
            acc = acc + jnp.dot(ho, wo[hd * DH:(hd + 1) * DH, :],
                                preferred_element_type=jnp.float32)         # (S, D)
        x = x + acc + bo                          # dropout == identity (eval)

        # ---- sublayer 2: pre-norm position-wise feed-forward + residual ----
        h2 = _layernorm(x, ln2_g, ln2_b)
        ff = jnp.dot(h2, w1, preferred_element_type=jnp.float32) + b1
        ff = jnp.maximum(ff, 0.0)
        x = x + jnp.dot(ff, w2, preferred_element_type=jnp.float32) + b2

    # final LayerNorm (fp32 compute, cast back to input dtype)
    o_ref[0] = _layernorm(x, norm_g, norm_b).astype(o_ref.dtype)


# ------------------------------- wrapper -------------------------------------
def _full_spec(shape):
    # weights: full array, invariant over the batch grid axis
    return pl.BlockSpec(shape, lambda b: tuple(0 for _ in shape))


@jax.jit
def encoder_forward(x, mask, p):
    in_specs = [
        pl.BlockSpec((1, S, D), lambda b: (b, 0, 0)),   # x
        pl.BlockSpec((1, 1, S), lambda b: (b, 0, 0)),   # mask
        _full_spec((D, 3 * D)),                         # Wqkv (Wq pre-scaled)
        _full_spec((1, 3 * D)),                         # bqkv
        _full_spec((D, D)),                             # Wo
        _full_spec((D, DFF)),                           # W1
        _full_spec((1, DFF)),                           # b1
        _full_spec((DFF, D)),                           # W2
        _full_spec((8, D)),                             # packed vectors
    ]
    return pl.pallas_call(
        encoder_kernel,
        grid=(B,),
        in_specs=in_specs,
        out_specs=pl.BlockSpec((1, S, D), lambda b: (b, 0, 0)),
        out_shape=jax.ShapeDtypeStruct((B, S, D), x.dtype),
        compiler_params=pltpu.CompilerParams(dimension_semantics=("parallel",)),
    )(x, mask,
      p["wqkv"], p["bqkv"], p["wo"], p["w1"], p["b1"], p["w2"], p["vec_d"])


# --------------------------- deterministic init -------------------------------
def init_params(key):
    def linear(k, fan_in, fan_out):
        kw, kb = jax.random.split(k)
        bound = 1.0 / math.sqrt(fan_in)
        w = jax.random.uniform(kw, (fan_in, fan_out), jnp.float32, -bound, bound)
        b = jax.random.uniform(kb, (1, fan_out), jnp.float32, -bound, bound)
        return w, b

    ks = jax.random.split(key, 6)
    wq, bq = linear(ks[0], D, D)
    wk, bk = linear(ks[1], D, D)
    wv, bv = linear(ks[2], D, D)
    wo, bo = linear(ks[3], D, D)
    w1, b1 = linear(ks[4], D, DFF)
    w2, b2 = linear(ks[5], DFF, D)

    # Fold the 1/sqrt(DH) attention scale into Wq / bq (one-time, host side),
    # and fuse Q/K/V into a single (D, 3D) projection.
    scale = 1.0 / math.sqrt(DH)
    wqkv = jnp.concatenate([wq * scale, wk, wv], axis=1)   # (D, 3D)
    bqkv = jnp.concatenate([bq * scale, bk, bv], axis=1)   # (1, 3D)

    ones = jnp.ones((1, D), jnp.float32)
    zeros = jnp.zeros((1, D), jnp.float32)
    # Packed (8, D) vector table: [bo, ln1_g, ln1_b, ln2_g, ln2_b, b2, norm_g, norm_b]
    vec_d = jnp.concatenate(
        [bo, ones, zeros, ones, zeros, b2, ones, zeros], axis=0)

    return dict(wqkv=wqkv, bqkv=bqkv, wo=wo, w1=w1, b1=b1, w2=w2, vec_d=vec_d)


if __name__ == "__main__":
    key = jax.random.PRNGKey(0)
    kx, kp = jax.random.split(key)

    x = jax.random.normal(kx, (B, S, D), jnp.float32)
    # mask: (B, 1, S); last key position of batch 1 is masked out, rest visible
    mask = jnp.ones((B, 1, S), jnp.float32).at[1, 0, S - 1].set(0.0)

    params = init_params(kp)

    out = encoder_forward(x, mask, params)
    out = jax.block_until_ready(out)
    assert out.shape == (B, S, D) and out.dtype == jnp.float32
    assert bool(jnp.all(jnp.isfinite(out)))
    print("KERNEL_OK")
</pallas_src>

<mosaic_0001>
module attributes {stable_mosaic.version = 11 : i64} {
  func.func @encoder_kernel(%arg0: i32, %arg1: memref<1x8x32xf32, #tpu.memory_space<vmem>>, %arg2: memref<1x1x8xf32, #tpu.memory_space<vmem>>, %arg3: memref<32x96xf32, #tpu.memory_space<vmem>>, %arg4: memref<1x96xf32, #tpu.memory_space<vmem>>, %arg5: memref<32x32xf32, #tpu.memory_space<vmem>>, %arg6: memref<32x64xf32, #tpu.memory_space<vmem>>, %arg7: memref<1x64xf32, #tpu.memory_space<vmem>>, %arg8: memref<64x32xf32, #tpu.memory_space<vmem>>, %arg9: memref<8x32xf32, #tpu.memory_space<vmem>>, %arg10: memref<1x8x32xf32, #tpu.memory_space<vmem>>) attributes {dimension_semantics = [#tpu.dimension_semantics<parallel>], iteration_bounds = array<i64: 2>, scalar_prefetch = 0 : i64, scratch_operands = 0 : i64, tpu.core_type = #tpu.core_type<tc>, window_params = [{transform_indices = @transform_0, window_bounds = array<i64: 1, 8, 32>}, {transform_indices = @transform_1, window_bounds = array<i64: 1, 1, 8>}, {pipeline_mode = #tpu.pipeline_mode<synchronous>, transform_indices = @transform_2, window_bounds = array<i64: 32, 96>}, {pipeline_mode = #tpu.pipeline_mode<synchronous>, transform_indices = @transform_3, window_bounds = array<i64: 1, 96>}, {pipeline_mode = #tpu.pipeline_mode<synchronous>, transform_indices = @transform_4, window_bounds = array<i64: 32, 32>}, {pipeline_mode = #tpu.pipeline_mode<synchronous>, transform_indices = @transform_5, window_bounds = array<i64: 32, 64>}, {pipeline_mode = #tpu.pipeline_mode<synchronous>, transform_indices = @transform_6, window_bounds = array<i64: 1, 64>}, {pipeline_mode = #tpu.pipeline_mode<synchronous>, transform_indices = @transform_7, window_bounds = array<i64: 64, 32>}, {pipeline_mode = #tpu.pipeline_mode<synchronous>, transform_indices = @transform_8, window_bounds = array<i64: 8, 32>}, {transform_indices = @transform_9, window_bounds = array<i64: 1, 8, 32>}]} {
    %c0 = arith.constant 0 : index
    %c0_0 = arith.constant 0 : index
    %c0_1 = arith.constant 0 : index
    %0 = vector.load %arg1[%c0, %c0_0, %c0_1] : memref<1x8x32xf32, #tpu.memory_space<vmem>>, vector<1x8x32xf32>
    %1 = vector.shape_cast %0 : vector<1x8x32xf32> to vector<8x32xf32>
    %c0_2 = arith.constant 0 : index
    %c0_3 = arith.constant 0 : index
    %c0_4 = arith.constant 0 : index
    %2 = vector.load %arg2[%c0_2, %c0_3, %c0_4] : memref<1x1x8xf32, #tpu.memory_space<vmem>>, vector<1x1x8xf32>
    %3 = vector.shape_cast %2 : vector<1x1x8xf32> to vector<1x8xf32>
    %cst = arith.constant 0.000000e+00 : f32
    %4 = vector.broadcast %cst : f32 to vector<1x8xf32>
    %5 = arith.cmpf oeq, %3, %4 : vector<1x8xf32>
    %cst_5 = arith.constant -1.000000e+09 : f32
    %cst_6 = arith.constant 0.000000e+00 : f32
    %6 = vector.broadcast %cst_5 : f32 to vector<1x8xf32>
    %7 = vector.broadcast %cst_6 : f32 to vector<1x8xf32>
    %8 = arith.select %5, %6, %7 : vector<1x8xi1>, vector<1x8xf32>
    %c0_7 = arith.constant 0 : index
    %c0_8 = arith.constant 0 : index
    %9 = vector.load %arg3[%c0_7, %c0_8] : memref<32x96xf32, #tpu.memory_space<vmem>>, vector<32x96xf32>
    %c0_9 = arith.constant 0 : index
    %c0_10 = arith.constant 0 : index
    %10 = vector.load %arg4[%c0_9, %c0_10] : memref<1x96xf32, #tpu.memory_space<vmem>>, vector<1x96xf32>
    %c0_11 = arith.constant 0 : index
    %c0_12 = arith.constant 0 : index
    %11 = vector.load %arg5[%c0_11, %c0_12] : memref<32x32xf32, #tpu.memory_space<vmem>>, vector<32x32xf32>
    %c0_13 = arith.constant 0 : index
    %c0_14 = arith.constant 0 : index
    %12 = vector.load %arg6[%c0_13, %c0_14] : memref<32x64xf32, #tpu.memory_space<vmem>>, vector<32x64xf32>
    %c0_15 = arith.constant 0 : index
    %c0_16 = arith.constant 0 : index
    %13 = vector.load %arg7[%c0_15, %c0_16] : memref<1x64xf32, #tpu.memory_space<vmem>>, vector<1x64xf32>
    %c0_17 = arith.constant 0 : index
    %c0_18 = arith.constant 0 : index
    %14 = vector.load %arg8[%c0_17, %c0_18] : memref<64x32xf32, #tpu.memory_space<vmem>>, vector<64x32xf32>
    %c0_19 = arith.constant 0 : index
    %c0_20 = arith.constant 0 : index
    %15 = vector.load %arg9[%c0_19, %c0_20] : memref<8x32xf32, #tpu.memory_space<vmem>>, vector<1x32xf32>
    %c1 = arith.constant 1 : index
    %c0_21 = arith.constant 0 : index
    %16 = vector.load %arg9[%c1, %c0_21] : memref<8x32xf32, #tpu.memory_space<vmem>>, vector<1x32xf32>
    %c2 = arith.constant 2 : index
    %c0_22 = arith.constant 0 : index
    %17 = vector.load %arg9[%c2, %c0_22] : memref<8x32xf32, #tpu.memory_space<vmem>>, vector<1x32xf32>
    %c3 = arith.constant 3 : index
    %c0_23 = arith.constant 0 : index
    %18 = vector.load %arg9[%c3, %c0_23] : memref<8x32xf32, #tpu.memory_space<vmem>>, vector<1x32xf32>
    %c4 = arith.constant 4 : index
    %c0_24 = arith.constant 0 : index
    %19 = vector.load %arg9[%c4, %c0_24] : memref<8x32xf32, #tpu.memory_space<vmem>>, vector<1x32xf32>
    %c5 = arith.constant 5 : index
    %c0_25 = arith.constant 0 : index
    %20 = vector.load %arg9[%c5, %c0_25] : memref<8x32xf32, #tpu.memory_space<vmem>>, vector<1x32xf32>
    %c6 = arith.constant 6 : index
    %c0_26 = arith.constant 0 : index
    %21 = vector.load %arg9[%c6, %c0_26] : memref<8x32xf32, #tpu.memory_space<vmem>>, vector<1x32xf32>
    %c7 = arith.constant 7 : index
    %c0_27 = arith.constant 0 : index
    %22 = vector.load %arg9[%c7, %c0_27] : memref<8x32xf32, #tpu.memory_space<vmem>>, vector<1x32xf32>
    %cst_28 = arith.constant dense<0.000000e+00> : vector<8xf32>
    %23 = vector.multi_reduction <add>, %1, %cst_28 [1] : vector<8x32xf32> to vector<8xf32>
    %24 = vector.shape_cast %23 : vector<8xf32> to vector<8x1xf32>
    %cst_29 = arith.constant 3.200000e+01 : f32
    %25 = vector.broadcast %cst_29 : f32 to vector<8x1xf32>
    %26 = arith.divf %24, %25 : vector<8x1xf32>
    %27 = vector.broadcast %26 : vector<8x1xf32> to vector<8x32xf32>
    %28 = arith.subf %1, %27 : vector<8x32xf32>
    %29 = arith.mulf %28, %28 : vector<8x32xf32>
    %cst_30 = arith.constant dense<0.000000e+00> : vector<8xf32>
    %30 = vector.multi_reduction <add>, %29, %cst_30 [1] : vector<8x32xf32> to vector<8xf32>
    %31 = vector.shape_cast %30 : vector<8xf32> to vector<8x1xf32>
    %cst_31 = arith.constant 3.200000e+01 : f32
    %32 = vector.broadcast %cst_31 : f32 to vector<8x1xf32>
    %33 = arith.divf %31, %32 : vector<8x1xf32>
    %34 = vector.broadcast %26 : vector<8x1xf32> to vector<8x32xf32>
    %35 = arith.subf %1, %34 : vector<8x32xf32>
    %cst_32 = arith.constant 9.99999974E-6 : f32
    %36 = vector.broadcast %cst_32 : f32 to vector<8x1xf32>
    %37 = arith.addf %33, %36 : vector<8x1xf32>
    %38 = math.rsqrt %37 : vector<8x1xf32>
    %39 = vector.broadcast %38 : vector<8x1xf32> to vector<8x32xf32>
    %40 = arith.mulf %35, %39 : vector<8x32xf32>
    %41 = vector.broadcast %16 : vector<1x32xf32> to vector<8x32xf32>
    %42 = arith.mulf %40, %41 : vector<8x32xf32>
    %43 = vector.broadcast %17 : vector<1x32xf32> to vector<8x32xf32>
    %44 = arith.addf %42, %43 : vector<8x32xf32>
    %cst_33 = arith.constant dense<0.000000e+00> : vector<8x96xf32>
    %45 = tpu.matmul %44, %9, %cst_33 {dimension_numbers = #tpu.dot_dimension_numbers<[1], [0], [0], [1], [0, 0, 1, 1], [], []>} : vector<8x32xf32>, vector<32x96xf32>, vector<8x96xf32> -> vector<8x96xf32>
    %46 = vector.broadcast %10 : vector<1x96xf32> to vector<8x96xf32>
    %47 = arith.addf %45, %46 : vector<8x96xf32>
    %cst_34 = arith.constant 0.000000e+00 : f32
    %48 = vector.broadcast %cst_34 : f32 to vector<8x32xf32>
    %49 = vector.extract_strided_slice %47 {offsets = [0, 0], sizes = [8, 8], strides = [1, 1]} : vector<8x96xf32> to vector<8x8xf32>
    %50 = vector.extract_strided_slice %47 {offsets = [0, 32], sizes = [8, 8], strides = [1, 1]} : vector<8x96xf32> to vector<8x8xf32>
    %51 = vector.extract_strided_slice %47 {offsets = [0, 64], sizes = [8, 8], strides = [1, 1]} : vector<8x96xf32> to vector<8x8xf32>
    %cst_35 = arith.constant dense<0.000000e+00> : vector<8x8xf32>
    %52 = tpu.matmul %49, %50, %cst_35 {dimension_numbers = #tpu.dot_dimension_numbers<[1], [1], [0], [0], [0, 0, 1, 0], [], []>} : vector<8x8xf32>, vector<8x8xf32>, vector<8x8xf32> -> vector<8x8xf32>
    %53 = vector.broadcast %8 : vector<1x8xf32> to vector<8x8xf32>
    %54 = arith.addf %52, %53 : vector<8x8xf32>
    %cst_36 = arith.constant dense<0xFF800000> : vector<8xf32>
    %55 = vector.multi_reduction <maximumf>, %54, %cst_36 [1] : vector<8x8xf32> to vector<8xf32>
    %56 = vector.shape_cast %55 : vector<8xf32> to vector<8x1xf32>
    %57 = vector.broadcast %56 : vector<8x1xf32> to vector<8x8xf32>
    %58 = arith.subf %54, %57 : vector<8x8xf32>
    %59 = math.exp %58 : vector<8x8xf32>
    %cst_37 = arith.constant dense<0.000000e+00> : vector<8xf32>
    %60 = vector.multi_reduction <add>, %59, %cst_37 [1] : vector<8x8xf32> to vector<8xf32>
    %61 = vector.shape_cast %60 : vector<8xf32> to vector<8x1xf32>
    %62 = tpu.reciprocal %61 {approx = true} : vector<8x1xf32> -> vector<8x1xf32>
    %63 = vector.broadcast %62 : vector<8x1xf32> to vector<8x8xf32>
    %64 = arith.mulf %59, %63 : vector<8x8xf32>
    %cst_38 = arith.constant dense<0.000000e+00> : vector<8x8xf32>
    %65 = tpu.matmul %64, %51, %cst_38 {dimension_numbers = #tpu.dot_dimension_numbers<[1], [0], [0], [1], [0, 0, 1, 1], [], []>} : vector<8x8xf32>, vector<8x8xf32>, vector<8x8xf32> -> vector<8x8xf32>
    %66 = vector.extract_strided_slice %11 {offsets = [0, 0], sizes = [8, 32], strides = [1, 1]} : vector<32x32xf32> to vector<8x32xf32>
    %cst_39 = arith.constant dense<0.000000e+00> : vector<8x32xf32>
    %67 = tpu.matmul %65, %66, %cst_39 {dimension_numbers = #tpu.dot_dimension_numbers<[1], [0], [0], [1], [0, 0, 1, 1], [], []>} : vector<8x8xf32>, vector<8x32xf32>, vector<8x32xf32> -> vector<8x32xf32>
    %68 = arith.addf %48, %67 : vector<8x32xf32>
    %69 = vector.extract_strided_slice %47 {offsets = [0, 8], sizes = [8, 8], strides = [1, 1]} : vector<8x96xf32> to vector<8x8xf32>
    %70 = vector.extract_strided_slice %47 {offsets = [0, 40], sizes = [8, 8], strides = [1, 1]} : vector<8x96xf32> to vector<8x8xf32>
    %71 = vector.extract_strided_slice %47 {offsets = [0, 72], sizes = [8, 8], strides = [1, 1]} : vector<8x96xf32> to vector<8x8xf32>
    %cst_40 = arith.constant dense<0.000000e+00> : vector<8x8xf32>
    %72 = tpu.matmul %69, %70, %cst_40 {dimension_numbers = #tpu.dot_dimension_numbers<[1], [1], [0], [0], [0, 0, 1, 0], [], []>} : vector<8x8xf32>, vector<8x8xf32>, vector<8x8xf32> -> vector<8x8xf32>
    %73 = vector.broadcast %8 : vector<1x8xf32> to vector<8x8xf32>
    %74 = arith.addf %72, %73 : vector<8x8xf32>
    %cst_41 = arith.constant dense<0xFF800000> : vector<8xf32>
    %75 = vector.multi_reduction <maximumf>, %74, %cst_41 [1] : vector<8x8xf32> to vector<8xf32>
    %76 = vector.shape_cast %75 : vector<8xf32> to vector<8x1xf32>
    %77 = vector.broadcast %76 : vector<8x1xf32> to vector<8x8xf32>
    %78 = arith.subf %74, %77 : vector<8x8xf32>
    %79 = math.exp %78 : vector<8x8xf32>
    %cst_42 = arith.constant dense<0.000000e+00> : vector<8xf32>
    %80 = vector.multi_reduction <add>, %79, %cst_42 [1] : vector<8x8xf32> to vector<8xf32>
    %81 = vector.shape_cast %80 : vector<8xf32> to vector<8x1xf32>
    %82 = tpu.reciprocal %81 {approx = true} : vector<8x1xf32> -> vector<8x1xf32>
    %83 = vector.broadcast %82 : vector<8x1xf32> to vector<8x8xf32>
    %84 = arith.mulf %79, %83 : vector<8x8xf32>
    %cst_43 = arith.constant dense<0.000000e+00> : vector<8x8xf32>
    %85 = tpu.matmul %84, %71, %cst_43 {dimension_numbers = #tpu.dot_dimension_numbers<[1], [0], [0], [1], [0, 0, 1, 1], [], []>} : vector<8x8xf32>, vector<8x8xf32>, vector<8x8xf32> -> vector<8x8xf32>
    %86 = vector.extract_strided_slice %11 {offsets = [8, 0], sizes = [8, 32], strides = [1, 1]} : vector<32x32xf32> to vector<8x32xf32>
    %cst_44 = arith.constant dense<0.000000e+00> : vector<8x32xf32>
    %87 = tpu.matmul %85, %86, %cst_44 {dimension_numbers = #tpu.dot_dimension_numbers<[1], [0], [0], [1], [0, 0, 1, 1], [], []>} : vector<8x8xf32>, vector<8x32xf32>, vector<8x32xf32> -> vector<8x32xf32>
    %88 = arith.addf %68, %87 : vector<8x32xf32>
    %89 = vector.extract_strided_slice %47 {offsets = [0, 16], sizes = [8, 8], strides = [1, 1]} : vector<8x96xf32> to vector<8x8xf32>
    %90 = vector.extract_strided_slice %47 {offsets = [0, 48], sizes = [8, 8], strides = [1, 1]} : vector<8x96xf32> to vector<8x8xf32>
    %91 = vector.extract_strided_slice %47 {offsets = [0, 80], sizes = [8, 8], strides = [1, 1]} : vector<8x96xf32> to vector<8x8xf32>
    %cst_45 = arith.constant dense<0.000000e+00> : vector<8x8xf32>
    %92 = tpu.matmul %89, %90, %cst_45 {dimension_numbers = #tpu.dot_dimension_numbers<[1], [1], [0], [0], [0, 0, 1, 0], [], []>} : vector<8x8xf32>, vector<8x8xf32>, vector<8x8xf32> -> vector<8x8xf32>
    %93 = vector.broadcast %8 : vector<1x8xf32> to vector<8x8xf32>
    %94 = arith.addf %92, %93 : vector<8x8xf32>
    %cst_46 = arith.constant dense<0xFF800000> : vector<8xf32>
    %95 = vector.multi_reduction <maximumf>, %94, %cst_46 [1] : vector<8x8xf32> to vector<8xf32>
    %96 = vector.shape_cast %95 : vector<8xf32> to vector<8x1xf32>
    %97 = vector.broadcast %96 : vector<8x1xf32> to vector<8x8xf32>
    %98 = arith.subf %94, %97 : vector<8x8xf32>
    %99 = math.exp %98 : vector<8x8xf32>
    %cst_47 = arith.constant dense<0.000000e+00> : vector<8xf32>
    %100 = vector.multi_reduction <add>, %99, %cst_47 [1] : vector<8x8xf32> to vector<8xf32>
    %101 = vector.shape_cast %100 : vector<8xf32> to vector<8x1xf32>
    %102 = tpu.reciprocal %101 {approx = true} : vector<8x1xf32> -> vector<8x1xf32>
    %103 = vector.broadcast %102 : vector<8x1xf32> to vector<8x8xf32>
    %104 = arith.mulf %99, %103 : vector<8x8xf32>
    %cst_48 = arith.constant dense<0.000000e+00> : vector<8x8xf32>
    %105 = tpu.matmul %104, %91, %cst_48 {dimension_numbers = #tpu.dot_dimension_numbers<[1], [0], [0], [1], [0, 0, 1, 1], [], []>} : vector<8x8xf32>, vector<8x8xf32>, vector<8x8xf32> -> vector<8x8xf32>
    %106 = vector.extract_strided_slice %11 {offsets = [16, 0], sizes = [8, 32], strides = [1, 1]} : vector<32x32xf32> to vector<8x32xf32>
    %cst_49 = arith.constant dense<0.000000e+00> : vector<8x32xf32>
    %107 = tpu.matmul %105, %106, %cst_49 {dimension_numbers = #tpu.dot_dimension_numbers<[1], [0], [0], [1], [0, 0, 1, 1], [], []>} : vector<8x8xf32>, vector<8x32xf32>, vector<8x32xf32> -> vector<8x32xf32>
    %108 = arith.addf %88, %107 : vector<8x32xf32>
    %109 = vector.extract_strided_slice %47 {offsets = [0, 24], sizes = [8, 8], strides = [1, 1]} : vector<8x96xf32> to vector<8x8xf32>
    %110 = vector.extract_strided_slice %47 {offsets = [0, 56], sizes = [8, 8], strides = [1, 1]} : vector<8x96xf32> to vector<8x8xf32>
    %111 = vector.extract_strided_slice %47 {offsets = [0, 88], sizes = [8, 8], strides = [1, 1]} : vector<8x96xf32> to vector<8x8xf32>
    %cst_50 = arith.constant dense<0.000000e+00> : vector<8x8xf32>
    %112 = tpu.matmul %109, %110, %cst_50 {dimension_numbers = #tpu.dot_dimension_numbers<[1], [1], [0], [0], [0, 0, 1, 0], [], []>} : vector<8x8xf32>, vector<8x8xf32>, vector<8x8xf32> -> vector<8x8xf32>
    %113 = vector.broadcast %8 : vector<1x8xf32> to vector<8x8xf32>
    %114 = arith.addf %112, %113 : vector<8x8xf32>
    %cst_51 = arith.constant dense<0xFF800000> : vector<8xf32>
    %115 = vector.multi_reduction <maximumf>, %114, %cst_51 [1] : vector<8x8xf32> to vector<8xf32>
    %116 = vector.shape_cast %115 : vector<8xf32> to vector<8x1xf32>
    %117 = vector.broadcast %116 : vector<8x1xf32> to vector<8x8xf32>
    %118 = arith.subf %114, %117 : vector<8x8xf32>
    %119 = math.exp %118 : vector<8x8xf32>
    %cst_52 = arith.constant dense<0.000000e+00> : vector<8xf32>
    %120 = vector.multi_reduction <add>, %119, %cst_52 [1] : vector<8x8xf32> to vector<8xf32>
    %121 = vector.shape_cast %120 : vector<8xf32> to vector<8x1xf32>
    %122 = tpu.reciprocal %121 {approx = true} : vector<8x1xf32> -> vector<8x1xf32>
    %123 = vector.broadcast %122 : vector<8x1xf32> to vector<8x8xf32>
    %124 = arith.mulf %119, %123 : vector<8x8xf32>
    %cst_53 = arith.constant dense<0.000000e+00> : vector<8x8xf32>
    %125 = tpu.matmul %124, %111, %cst_53 {dimension_numbers = #tpu.dot_dimension_numbers<[1], [0], [0], [1], [0, 0, 1, 1], [], []>} : vector<8x8xf32>, vector<8x8xf32>, vector<8x8xf32> -> vector<8x8xf32>
    %126 = vector.extract_strided_slice %11 {offsets = [24, 0], sizes = [8, 32], strides = [1, 1]} : vector<32x32xf32> to vector<8x32xf32>
    %cst_54 = arith.constant dense<0.000000e+00> : vector<8x32xf32>
    %127 = tpu.matmul %125, %126, %cst_54 {dimension_numbers = #tpu.dot_dimension_numbers<[1], [0], [0], [1], [0, 0, 1, 1], [], []>} : vector<8x8xf32>, vector<8x32xf32>, vector<8x32xf32> -> vector<8x32xf32>
    %128 = arith.addf %108, %127 : vector<8x32xf32>
    %129 = arith.addf %1, %128 : vector<8x32xf32>
    %130 = vector.broadcast %15 : vector<1x32xf32> to vector<8x32xf32>
    %131 = arith.addf %129, %130 : vector<8x32xf32>
    %cst_55 = arith.constant dense<0.000000e+00> : vector<8xf32>
    %132 = vector.multi_reduction <add>, %131, %cst_55 [1] : vector<8x32xf32> to vector<8xf32>
    %133 = vector.shape_cast %132 : vector<8xf32> to vector<8x1xf32>
    %cst_56 = arith.constant 3.200000e+01 : f32
    %134 = vector.broadcast %cst_56 : f32 to vector<8x1xf32>
    %135 = arith.divf %133, %134 : vector<8x1xf32>
    %136 = vector.broadcast %135 : vector<8x1xf32> to vector<8x32xf32>
    %137 = arith.subf %131, %136 : vector<8x32xf32>
    %138 = arith.mulf %137, %137 : vector<8x32xf32>
    %cst_57 = arith.constant dense<0.000000e+00> : vector<8xf32>
    %139 = vector.multi_reduction <add>, %138, %cst_57 [1] : vector<8x32xf32> to vector<8xf32>
    %140 = vector.shape_cast %139 : vector<8xf32> to vector<8x1xf32>
    %cst_58 = arith.constant 3.200000e+01 : f32
    %141 = vector.broadcast %cst_58 : f32 to vector<8x1xf32>
    %142 = arith.divf %140, %141 : vector<8x1xf32>
    %143 = vector.broadcast %135 : vector<8x1xf32> to vector<8x32xf32>
    %144 = arith.subf %131, %143 : vector<8x32xf32>
    %cst_59 = arith.constant 9.99999974E-6 : f32
    %145 = vector.broadcast %cst_59 : f32 to vector<8x1xf32>
    %146 = arith.addf %142, %145 : vector<8x1xf32>
    %147 = math.rsqrt %146 : vector<8x1xf32>
    %148 = vector.broadcast %147 : vector<8x1xf32> to vector<8x32xf32>
    %149 = arith.mulf %144, %148 : vector<8x32xf32>
    %150 = vector.broadcast %18 : vector<1x32xf32> to vector<8x32xf32>
    %151 = arith.mulf %149, %150 : vector<8x32xf32>
    %152 = vector.broadcast %19 : vector<1x32xf32> to vector<8x32xf32>
    %153 = arith.addf %151, %152 : vector<8x32xf32>
    %cst_60 = arith.constant dense<0.000000e+00> : vector<8x64xf32>
    %154 = tpu.matmul %153, %12, %cst_60 {dimension_numbers = #tpu.dot_dimension_numbers<[1], [0], [0], [1], [0, 0, 1, 1], [], []>} : vector<8x32xf32>, vector<32x64xf32>, vector<8x64xf32> -> vector<8x64xf32>
    %155 = vector.broadcast %13 : vector<1x64xf32> to vector<8x64xf32>
    %156 = arith.addf %154, %155 : vector<8x64xf32>
    %cst_61 = arith.constant 0.000000e+00 : f32
    %157 = vector.broadcast %cst_61 : f32 to vector<8x64xf32>
    %158 = arith.maximumf %156, %157 : vector<8x64xf32>
    %cst_62 = arith.constant dense<0.000000e+00> : vector<8x32xf32>
    %159 = tpu.matmul %158, %14, %cst_62 {dimension_numbers = #tpu.dot_dimension_numbers<[1], [0], [0], [1], [0, 0, 1, 1], [], []>} : vector<8x64xf32>, vector<64x32xf32>, vector<8x32xf32> -> vector<8x32xf32>
    %160 = arith.addf %131, %159 : vector<8x32xf32>
    %161 = vector.broadcast %20 : vector<1x32xf32> to vector<8x32xf32>
    %162 = arith.addf %160, %161 : vector<8x32xf32>
    %cst_63 = arith.constant dense<0.000000e+00> : vector<8xf32>
    %163 = vector.multi_reduction <add>, %162, %cst_63 [1] : vector<8x32xf32> to vector<8xf32>
    %164 = vector.shape_cast %163 : vector<8xf32> to vector<8x1xf32>
    %cst_64 = arith.constant 3.200000e+01 : f32
    %165 = vector.broadcast %cst_64 : f32 to vector<8x1xf32>
    %166 = arith.divf %164, %165 : vector<8x1xf32>
    %167 = vector.broadcast %166 : vector<8x1xf32> to vector<8x32xf32>
    %168 = arith.subf %162, %167 : vector<8x32xf32>
    %169 = arith.mulf %168, %168 : vector<8x32xf32>
    %cst_65 = arith.constant dense<0.000000e+00> : vector<8xf32>
    %170 = vector.multi_reduction <add>, %169, %cst_65 [1] : vector<8x32xf32> to vector<8xf32>
    %171 = vector.shape_cast %170 : vector<8xf32> to vector<8x1xf32>
    %cst_66 = arith.constant 3.200000e+01 : f32
    %172 = vector.broadcast %cst_66 : f32 to vector<8x1xf32>
    %173 = arith.divf %171, %172 : vector<8x1xf32>
    %174 = vector.broadcast %166 : vector<8x1xf32> to vector<8x32xf32>
    %175 = arith.subf %162, %174 : vector<8x32xf32>
    %cst_67 = arith.constant 9.99999974E-6 : f32
    %176 = vector.broadcast %cst_67 : f32 to vector<8x1xf32>
    %177 = arith.addf %173, %176 : vector<8x1xf32>
    %178 = math.rsqrt %177 : vector<8x1xf32>
    %179 = vector.broadcast %178 : vector<8x1xf32> to vector<8x32xf32>
    %180 = arith.mulf %175, %179 : vector<8x32xf32>
    %181 = vector.broadcast %16 : vector<1x32xf32> to vector<8x32xf32>
    %182 = arith.mulf %180, %181 : vector<8x32xf32>
    %183 = vector.broadcast %17 : vector<1x32xf32> to vector<8x32xf32>
    %184 = arith.addf %182, %183 : vector<8x32xf32>
    %cst_68 = arith.constant dense<0.000000e+00> : vector<8x96xf32>
    %185 = tpu.matmul %184, %9, %cst_68 {dimension_numbers = #tpu.dot_dimension_numbers<[1], [0], [0], [1], [0, 0, 1, 1], [], []>} : vector<8x32xf32>, vector<32x96xf32>, vector<8x96xf32> -> vector<8x96xf32>
    %186 = vector.broadcast %10 : vector<1x96xf32> to vector<8x96xf32>
    %187 = arith.addf %185, %186 : vector<8x96xf32>
    %cst_69 = arith.constant 0.000000e+00 : f32
    %188 = vector.broadcast %cst_69 : f32 to vector<8x32xf32>
    %189 = vector.extract_strided_slice %187 {offsets = [0, 0], sizes = [8, 8], strides = [1, 1]} : vector<8x96xf32> to vector<8x8xf32>
    %190 = vector.extract_strided_slice %187 {offsets = [0, 32], sizes = [8, 8], strides = [1, 1]} : vector<8x96xf32> to vector<8x8xf32>
    %191 = vector.extract_strided_slice %187 {offsets = [0, 64], sizes = [8, 8], strides = [1, 1]} : vector<8x96xf32> to vector<8x8xf32>
    %cst_70 = arith.constant dense<0.000000e+00> : vector<8x8xf32>
    %192 = tpu.matmul %189, %190, %cst_70 {dimension_numbers = #tpu.dot_dimension_numbers<[1], [1], [0], [0], [0, 0, 1, 0], [], []>} : vector<8x8xf32>, vector<8x8xf32>, vector<8x8xf32> -> vector<8x8xf32>
    %193 = vector.broadcast %8 : vector<1x8xf32> to vector<8x8xf32>
    %194 = arith.addf %192, %193 : vector<8x8xf32>
    %cst_71 = arith.constant dense<0xFF800000> : vector<8xf32>
    %195 = vector.multi_reduction <maximumf>, %194, %cst_71 [1] : vector<8x8xf32> to vector<8xf32>
    %196 = vector.shape_cast %195 : vector<8xf32> to vector<8x1xf32>
    %197 = vector.broadcast %196 : vector<8x1xf32> to vector<8x8xf32>
    %198 = arith.subf %194, %197 : vector<8x8xf32>
    %199 = math.exp %198 : vector<8x8xf32>
    %cst_72 = arith.constant dense<0.000000e+00> : vector<8xf32>
    %200 = vector.multi_reduction <add>, %199, %cst_72 [1] : vector<8x8xf32> to vector<8xf32>
    %201 = vector.shape_cast %200 : vector<8xf32> to vector<8x1xf32>
    %202 = tpu.reciprocal %201 {approx = true} : vector<8x1xf32> -> vector<8x1xf32>
    %203 = vector.broadcast %202 : vector<8x1xf32> to vector<8x8xf32>
    %204 = arith.mulf %199, %203 : vector<8x8xf32>
    %cst_73 = arith.constant dense<0.000000e+00> : vector<8x8xf32>
    %205 = tpu.matmul %204, %191, %cst_73 {dimension_numbers = #tpu.dot_dimension_numbers<[1], [0], [0], [1], [0, 0, 1, 1], [], []>} : vector<8x8xf32>, vector<8x8xf32>, vector<8x8xf32> -> vector<8x8xf32>
    %206 = vector.extract_strided_slice %11 {offsets = [0, 0], sizes = [8, 32], strides = [1, 1]} : vector<32x32xf32> to vector<8x32xf32>
    %cst_74 = arith.constant dense<0.000000e+00> : vector<8x32xf32>
    %207 = tpu.matmul %205, %206, %cst_74 {dimension_numbers = #tpu.dot_dimension_numbers<[1], [0], [0], [1], [0, 0, 1, 1], [], []>} : vector<8x8xf32>, vector<8x32xf32>, vector<8x32xf32> -> vector<8x32xf32>
    %208 = arith.addf %188, %207 : vector<8x32xf32>
    %209 = vector.extract_strided_slice %187 {offsets = [0, 8], sizes = [8, 8], strides = [1, 1]} : vector<8x96xf32> to vector<8x8xf32>
    %210 = vector.extract_strided_slice %187 {offsets = [0, 40], sizes = [8, 8], strides = [1, 1]} : vector<8x96xf32> to vector<8x8xf32>
    %211 = vector.extract_strided_slice %187 {offsets = [0, 72], sizes = [8, 8], strides = [1, 1]} : vector<8x96xf32> to vector<8x8xf32>
    %cst_75 = arith.constant dense<0.000000e+00> : vector<8x8xf32>
    %212 = tpu.matmul %209, %210, %cst_75 {dimension_numbers = #tpu.dot_dimension_numbers<[1], [1], [0], [0], [0, 0, 1, 0], [], []>} : vector<8x8xf32>, vector<8x8xf32>, vector<8x8xf32> -> vector<8x8xf32>
    %213 = vector.broadcast %8 : vector<1x8xf32> to vector<8x8xf32>
    %214 = arith.addf %212, %213 : vector<8x8xf32>
    %cst_76 = arith.constant dense<0xFF800000> : vector<8xf32>
    %215 = vector.multi_reduction <maximumf>, %214, %cst_76 [1] : vector<8x8xf32> to vector<8xf32>
    %216 = vector.shape_cast %215 : vector<8xf32> to vector<8x1xf32>
    %217 = vector.broadcast %216 : vector<8x1xf32> to vector<8x8xf32>
    %218 = arith.subf %214, %217 : vector<8x8xf32>
    %219 = math.exp %218 : vector<8x8xf32>
    %cst_77 = arith.constant dense<0.000000e+00> : vector<8xf32>
    %220 = vector.multi_reduction <add>, %219, %cst_77 [1] : vector<8x8xf32> to vector<8xf32>
    %221 = vector.shape_cast %220 : vector<8xf32> to vector<8x1xf32>
    %222 = tpu.reciprocal %221 {approx = true} : vector<8x1xf32> -> vector<8x1xf32>
    %223 = vector.broadcast %222 : vector<8x1xf32> to vector<8x8xf32>
    %224 = arith.mulf %219, %223 : vector<8x8xf32>
    %cst_78 = arith.constant dense<0.000000e+00> : vector<8x8xf32>
    %225 = tpu.matmul %224, %211, %cst_78 {dimension_numbers = #tpu.dot_dimension_numbers<[1], [0], [0], [1], [0, 0, 1, 1], [], []>} : vector<8x8xf32>, vector<8x8xf32>, vector<8x8xf32> -> vector<8x8xf32>
    %226 = vector.extract_strided_slice %11 {offsets = [8, 0], sizes = [8, 32], strides = [1, 1]} : vector<32x32xf32> to vector<8x32xf32>
    %cst_79 = arith.constant dense<0.000000e+00> : vector<8x32xf32>
    %227 = tpu.matmul %225, %226, %cst_79 {dimension_numbers = #tpu.dot_dimension_numbers<[1], [0], [0], [1], [0, 0, 1, 1], [], []>} : vector<8x8xf32>, vector<8x32xf32>, vector<8x32xf32> -> vector<8x32xf32>
    %228 = arith.addf %208, %227 : vector<8x32xf32>
    %229 = vector.extract_strided_slice %187 {offsets = [0, 16], sizes = [8, 8], strides = [1, 1]} : vector<8x96xf32> to vector<8x8xf32>
    %230 = vector.extract_strided_slice %187 {offsets = [0, 48], sizes = [8, 8], strides = [1, 1]} : vector<8x96xf32> to vector<8x8xf32>
    %231 = vector.extract_strided_slice %187 {offsets = [0, 80], sizes = [8, 8], strides = [1, 1]} : vector<8x96xf32> to vector<8x8xf32>
    %cst_80 = arith.constant dense<0.000000e+00> : vector<8x8xf32>
    %232 = tpu.matmul %229, %230, %cst_80 {dimension_numbers = #tpu.dot_dimension_numbers<[1], [1], [0], [0], [0, 0, 1, 0], [], []>} : vector<8x8xf32>, vector<8x8xf32>, vector<8x8xf32> -> vector<8x8xf32>
    %233 = vector.broadcast %8 : vector<1x8xf32> to vector<8x8xf32>
    %234 = arith.addf %232, %233 : vector<8x8xf32>
    %cst_81 = arith.constant dense<0xFF800000> : vector<8xf32>
    %235 = vector.multi_reduction <maximumf>, %234, %cst_81 [1] : vector<8x8xf32> to vector<8xf32>
    %236 = vector.shape_cast %235 : vector<8xf32> to vector<8x1xf32>
    %237 = vector.broadcast %236 : vector<8x1xf32> to vector<8x8xf32>
    %238 = arith.subf %234, %237 : vector<8x8xf32>
    %239 = math.exp %238 : vector<8x8xf32>
    %cst_82 = arith.constant dense<0.000000e+00> : vector<8xf32>
    %240 = vector.multi_reduction <add>, %239, %cst_82 [1] : vector<8x8xf32> to vector<8xf32>
    %241 = vector.shape_cast %240 : vector<8xf32> to vector<8x1xf32>
    %242 = tpu.reciprocal %241 {approx = true} : vector<8x1xf32> -> vector<8x1xf32>
    %243 = vector.broadcast %242 : vector<8x1xf32> to vector<8x8xf32>
    %244 = arith.mulf %239, %243 : vector<8x8xf32>
    %cst_83 = arith.constant dense<0.000000e+00> : vector<8x8xf32>
    %245 = tpu.matmul %244, %231, %cst_83 {dimension_numbers = #tpu.dot_dimension_numbers<[1], [0], [0], [1], [0, 0, 1, 1], [], []>} : vector<8x8xf32>, vector<8x8xf32>, vector<8x8xf32> -> vector<8x8xf32>
    %246 = vector.extract_strided_slice %11 {offsets = [16, 0], sizes = [8, 32], strides = [1, 1]} : vector<32x32xf32> to vector<8x32xf32>
    %cst_84 = arith.constant dense<0.000000e+00> : vector<8x32xf32>
    %247 = tpu.matmul %245, %246, %cst_84 {dimension_numbers = #tpu.dot_dimension_numbers<[1], [0], [0], [1], [0, 0, 1, 1], [], []>} : vector<8x8xf32>, vector<8x32xf32>, vector<8x32xf32> -> vector<8x32xf32>
    %248 = arith.addf %228, %247 : vector<8x32xf32>
    %249 = vector.extract_strided_slice %187 {offsets = [0, 24], sizes = [8, 8], strides = [1, 1]} : vector<8x96xf32> to vector<8x8xf32>
    %250 = vector.extract_strided_slice %187 {offsets = [0, 56], sizes = [8, 8], strides = [1, 1]} : vector<8x96xf32> to vector<8x8xf32>
    %251 = vector.extract_strided_slice %187 {offsets = [0, 88], sizes = [8, 8], strides = [1, 1]} : vector<8x96xf32> to vector<8x8xf32>
    %cst_85 = arith.constant dense<0.000000e+00> : vector<8x8xf32>
    %252 = tpu.matmul %249, %250, %cst_85 {dimension_numbers = #tpu.dot_dimension_numbers<[1], [1], [0], [0], [0, 0, 1, 0], [], []>} : vector<8x8xf32>, vector<8x8xf32>, vector<8x8xf32> -> vector<8x8xf32>
    %253 = vector.broadcast %8 : vector<1x8xf32> to vector<8x8xf32>
    %254 = arith.addf %252, %253 : vector<8x8xf32>
    %cst_86 = arith.constant dense<0xFF800000> : vector<8xf32>
    %255 = vector.multi_reduction <maximumf>, %254, %cst_86 [1] : vector<8x8xf32> to vector<8xf32>
    %256 = vector.shape_cast %255 : vector<8xf32> to vector<8x1xf32>
    %257 = vector.broadcast %256 : vector<8x1xf32> to vector<8x8xf32>
    %258 = arith.subf %254, %257 : vector<8x8xf32>
    %259 = math.exp %258 : vector<8x8xf32>
    %cst_87 = arith.constant dense<0.000000e+00> : vector<8xf32>
    %260 = vector.multi_reduction <add>, %259, %cst_87 [1] : vector<8x8xf32> to vector<8xf32>
    %261 = vector.shape_cast %260 : vector<8xf32> to vector<8x1xf32>
    %262 = tpu.reciprocal %261 {approx = true} : vector<8x1xf32> -> vector<8x1xf32>
    %263 = vector.broadcast %262 : vector<8x1xf32> to vector<8x8xf32>
    %264 = arith.mulf %259, %263 : vector<8x8xf32>
    %cst_88 = arith.constant dense<0.000000e+00> : vector<8x8xf32>
    %265 = tpu.matmul %264, %251, %cst_88 {dimension_numbers = #tpu.dot_dimension_numbers<[1], [0], [0], [1], [0, 0, 1, 1], [], []>} : vector<8x8xf32>, vector<8x8xf32>, vector<8x8xf32> -> vector<8x8xf32>
    %266 = vector.extract_strided_slice %11 {offsets = [24, 0], sizes = [8, 32], strides = [1, 1]} : vector<32x32xf32> to vector<8x32xf32>
    %cst_89 = arith.constant dense<0.000000e+00> : vector<8x32xf32>
    %267 = tpu.matmul %265, %266, %cst_89 {dimension_numbers = #tpu.dot_dimension_numbers<[1], [0], [0], [1], [0, 0, 1, 1], [], []>} : vector<8x8xf32>, vector<8x32xf32>, vector<8x32xf32> -> vector<8x32xf32>
    %268 = arith.addf %248, %267 : vector<8x32xf32>
    %269 = arith.addf %162, %268 : vector<8x32xf32>
    %270 = vector.broadcast %15 : vector<1x32xf32> to vector<8x32xf32>
    %271 = arith.addf %269, %270 : vector<8x32xf32>
    %cst_90 = arith.constant dense<0.000000e+00> : vector<8xf32>
    %272 = vector.multi_reduction <add>, %271, %cst_90 [1] : vector<8x32xf32> to vector<8xf32>
    %273 = vector.shape_cast %272 : vector<8xf32> to vector<8x1xf32>
    %cst_91 = arith.constant 3.200000e+01 : f32
    %274 = vector.broadcast %cst_91 : f32 to vector<8x1xf32>
    %275 = arith.divf %273, %274 : vector<8x1xf32>
    %276 = vector.broadcast %275 : vector<8x1xf32> to vector<8x32xf32>
    %277 = arith.subf %271, %276 : vector<8x32xf32>
    %278 = arith.mulf %277, %277 : vector<8x32xf32>
    %cst_92 = arith.constant dense<0.000000e+00> : vector<8xf32>
    %279 = vector.multi_reduction <add>, %278, %cst_92 [1] : vector<8x32xf32> to vector<8xf32>
    %280 = vector.shape_cast %279 : vector<8xf32> to vector<8x1xf32>
    %cst_93 = arith.constant 3.200000e+01 : f32
    %281 = vector.broadcast %cst_93 : f32 to vector<8x1xf32>
    %282 = arith.divf %280, %281 : vector<8x1xf32>
    %283 = vector.broadcast %275 : vector<8x1xf32> to vector<8x32xf32>
    %284 = arith.subf %271, %283 : vector<8x32xf32>
    %cst_94 = arith.constant 9.99999974E-6 : f32
    %285 = vector.broadcast %cst_94 : f32 to vector<8x1xf32>
    %286 = arith.addf %282, %285 : vector<8x1xf32>
    %287 = math.rsqrt %286 : vector<8x1xf32>
    %288 = vector.broadcast %287 : vector<8x1xf32> to vector<8x32xf32>
    %289 = arith.mulf %284, %288 : vector<8x32xf32>
    %290 = vector.broadcast %18 : vector<1x32xf32> to vector<8x32xf32>
    %291 = arith.mulf %289, %290 : vector<8x32xf32>
    %292 = vector.broadcast %19 : vector<1x32xf32> to vector<8x32xf32>
    %293 = arith.addf %291, %292 : vector<8x32xf32>
    %cst_95 = arith.constant dense<0.000000e+00> : vector<8x64xf32>
    %294 = tpu.matmul %293, %12, %cst_95 {dimension_numbers = #tpu.dot_dimension_numbers<[1], [0], [0], [1], [0, 0, 1, 1], [], []>} : vector<8x32xf32>, vector<32x64xf32>, vector<8x64xf32> -> vector<8x64xf32>
    %295 = vector.broadcast %13 : vector<1x64xf32> to vector<8x64xf32>
    %296 = arith.addf %294, %295 : vector<8x64xf32>
    %cst_96 = arith.constant 0.000000e+00 : f32
    %297 = vector.broadcast %cst_96 : f32 to vector<8x64xf32>
    %298 = arith.maximumf %296, %297 : vector<8x64xf32>
    %cst_97 = arith.constant dense<0.000000e+00> : vector<8x32xf32>
    %299 = tpu.matmul %298, %14, %cst_97 {dimension_numbers = #tpu.dot_dimension_numbers<[1], [0], [0], [1], [0, 0, 1, 1], [], []>} : vector<8x64xf32>, vector<64x32xf32>, vector<8x32xf32> -> vector<8x32xf32>
    %300 = arith.addf %271, %299 : vector<8x32xf32>
    %301 = vector.broadcast %20 : vector<1x32xf32> to vector<8x32xf32>
    %302 = arith.addf %300, %301 : vector<8x32xf32>
    %cst_98 = arith.constant dense<0.000000e+00> : vector<8xf32>
    %303 = vector.multi_reduction <add>, %302, %cst_98 [1] : vector<8x32xf32> to vector<8xf32>
    %304 = vector.shape_cast %303 : vector<8xf32> to vector<8x1xf32>
    %cst_99 = arith.constant 3.200000e+01 : f32
    %305 = vector.broadcast %cst_99 : f32 to vector<8x1xf32>
    %306 = arith.divf %304, %305 : vector<8x1xf32>
    %307 = vector.broadcast %306 : vector<8x1xf32> to vector<8x32xf32>
    %308 = arith.subf %302, %307 : vector<8x32xf32>
    %309 = arith.mulf %308, %308 : vector<8x32xf32>
    %cst_100 = arith.constant dense<0.000000e+00> : vector<8xf32>
    %310 = vector.multi_reduction <add>, %309, %cst_100 [1] : vector<8x32xf32> to vector<8xf32>
    %311 = vector.shape_cast %310 : vector<8xf32> to vector<8x1xf32>
    %cst_101 = arith.constant 3.200000e+01 : f32
    %312 = vector.broadcast %cst_101 : f32 to vector<8x1xf32>
    %313 = arith.divf %311, %312 : vector<8x1xf32>
    %314 = vector.broadcast %306 : vector<8x1xf32> to vector<8x32xf32>
    %315 = arith.subf %302, %314 : vector<8x32xf32>
    %cst_102 = arith.constant 9.99999974E-6 : f32
    %316 = vector.broadcast %cst_102 : f32 to vector<8x1xf32>
    %317 = arith.addf %313, %316 : vector<8x1xf32>
    %318 = math.rsqrt %317 : vector<8x1xf32>
    %319 = vector.broadcast %318 : vector<8x1xf32> to vector<8x32xf32>
    %320 = arith.mulf %315, %319 : vector<8x32xf32>
    %321 = vector.broadcast %21 : vector<1x32xf32> to vector<8x32xf32>
    %322 = arith.mulf %320, %321 : vector<8x32xf32>
    %323 = vector.broadcast %22 : vector<1x32xf32> to vector<8x32xf32>
    %324 = arith.addf %322, %323 : vector<8x32xf32>
    %c0_103 = arith.constant 0 : index
    %c0_104 = arith.constant 0 : index
    %c0_105 = arith.constant 0 : index
    %325 = vector.load %arg10[%c0_103, %c0_104, %c0_105] : memref<1x8x32xf32, #tpu.memory_space<vmem>>, vector<1x8x32xf32>
    %326 = vector.shape_cast %325 : vector<1x8x32xf32> to vector<8x32xf32>
    %327 = vector.shape_cast %324 : vector<8x32xf32> to vector<1x8x32xf32>
    tpu.vector_store %arg10[%c0_103, %c0_104, %c0_105], %327 {strides = array<i32>} : memref<1x8x32xf32, #tpu.memory_space<vmem>>, vector<1x8x32xf32>,
    return
  }
  func.func @transform_0(%arg0: i32) -> (i32, i32, i32) {
    %c0_i32 = arith.constant 0 : i32
    %c0_i32_0 = arith.constant 0 : i32
    %c0_i32_1 = arith.constant 0 : i32
    return %arg0, %c0_i32, %c0_i32_0 : i32, i32, i32
  }
  func.func @transform_1(%arg0: i32) -> (i32, i32, i32) {
    %c0_i32 = arith.constant 0 : i32
    %c0_i32_0 = arith.constant 0 : i32
    %c0_i32_1 = arith.constant 0 : i32
    return %arg0, %c0_i32, %c0_i32_0 : i32, i32, i32
  }
  func.func @transform_2(%arg0: i32) -> (i32, i32) {
    %c0_i32 = arith.constant 0 : i32
    %c0_i32_0 = arith.constant 0 : i32
    %c0_i32_1 = arith.constant 0 : i32
    return %c0_i32, %c0_i32_0 : i32, i32
  }
  func.func @transform_3(%arg0: i32) -> (i32, i32) {
    %c0_i32 = arith.constant 0 : i32
    %c0_i32_0 = arith.constant 0 : i32
    %c0_i32_1 = arith.constant 0 : i32
    return %c0_i32, %c0_i32_0 : i32, i32
  }
  func.func @transform_4(%arg0: i32) -> (i32, i32) {
    %c0_i32 = arith.constant 0 : i32
    %c0_i32_0 = arith.constant 0 : i32
    %c0_i32_1 = arith.constant 0 : i32
    return %c0_i32, %c0_i32_0 : i32, i32
  }
  func.func @transform_5(%arg0: i32) -> (i32, i32) {
    %c0_i32 = arith.constant 0 : i32
    %c0_i32_0 = arith.constant 0 : i32
    %c0_i32_1 = arith.constant 0 : i32
    return %c0_i32, %c0_i32_0 : i32, i32
  }
  func.func @transform_6(%arg0: i32) -> (i32, i32) {
    %c0_i32 = arith.constant 0 : i32
    %c0_i32_0 = arith.constant 0 : i32
    %c0_i32_1 = arith.constant 0 : i32
    return %c0_i32, %c0_i32_0 : i32, i32
  }
  func.func @transform_7(%arg0: i32) -> (i32, i32) {
    %c0_i32 = arith.constant 0 : i32
    %c0_i32_0 = arith.constant 0 : i32
    %c0_i32_1 = arith.constant 0 : i32
    return %c0_i32, %c0_i32_0 : i32, i32
  }
  func.func @transform_8(%arg0: i32) -> (i32, i32) {
    %c0_i32 = arith.constant 0 : i32
    %c0_i32_0 = arith.constant 0 : i32
    %c0_i32_1 = arith.constant 0 : i32
    return %c0_i32, %c0_i32_0 : i32, i32
  }
  func.func @transform_9(%arg0: i32) -> (i32, i32, i32) {
    %c0_i32 = arith.constant 0 : i32
    %c0_i32_0 = arith.constant 0 : i32
    %c0_i32_1 = arith.constant 0 : i32
    return %arg0, %c0_i32, %c0_i32_0 : i32, i32, i32
  }
}

</mosaic_0001>

<bundles_post_ra>
// kernel: encoder_forward.1
= control target key start
LH: loop header
LB: loop body
LE: loop exit
PB: predicated region body
PF: predicated region fallthrough
CT: control target
= control target key end

     0   :  { %s4322_s0 = inlined_call_operand.hbm [shape: f32[2,8,32], index: 0, kind: input, shape index: {}]   ;;  %s4323_s1 = inlined_call_operand.vmem [shape: f32[2,1,8], index: 1, kind: input, shape index: {}]   ;;  %s4324_s2 = inlined_call_operand.vmem [shape: f32[32,96], index: 2, kind: input, shape index: {}]   ;;  %s4325_s3 = inlined_call_operand.vmem [shape: f32[1,96], index: 3, kind: input, shape index: {}]   ;;  %s4326_s4 = inlined_call_operand.vmem [shape: f32[32,32], index: 4, kind: input, shape index: {}]   ;;  %s4327_s5 = inlined_call_operand.vmem [shape: f32[32,64], index: 5, kind: input, shape index: {}]   ;;  %s4328_s6 = inlined_call_operand.hbm [shape: f32[1,64], index: 6, kind: input, shape index: {}]   ;;  %s4329_s7 = inlined_call_operand.vmem [shape: f32[64,32], index: 7, kind: input, shape index: {}]   ;;  %s4330_s8 = inlined_call_operand.vmem [shape: f32[8,32], index: 8, kind: input, shape index: {}]   ;;  %s4331_s9 = inlined_call_operand.hbm [shape: f32[2,8,32], index: 9, kind: output, shape index: {}]  }
   0x1   :  { %4343 = sst [smem:[#allocation11_spill]] %s4328_s6 }
   0x2   :  { %14 = vsyncpa [#allocation3], 0 }
   0x3   :  { %16 = vsyncpa [#allocation3 + $0x1], 0 }
   0x4   :  { %17 = vsyncpa [#allocation6], 0 }
   0x5   :  { %18 = vsyncpa [#allocation4], 0 }
   0x6   :  { %20 = vsyncpa [#allocation4 + $0x1], 0  ;;  %s3704_s30 = smov 0   ;;  %s3706_s10 = smov 0  }
   0x7   :  { %s3708_s11 = smov 0   ;;  %s3710_s12 = smov 0  }
   0x8 LB: > { %s3725_s13 = sadd.s32 4294967295, %s3635_s12   ;;  %s2996_s14 = sadd.s32 4294967294, %s3635_s12   ;;  %s3635_s12 = sphi %s3710_s12, %s4373_s12   ;;  %s3631_s11 = sphi %s3708_s11, %s4372_s11   ;;  %s3627_s10 = sphi %s3706_s10, %s4371_s10   ;;  %s3623_s30 = sphi %s3704_s30, %s4370_s30  }
   0x9   : > { %p46_p0 = scmp.ne.s32.totalorder %s3627_s10, %s3623_s30  ;;  %p4332_p1 = scmp.eq.s32.totalorder %s3725_s13, 0 }
   0xa   : > { %p249_p3 = scmp.eq.s32.totalorder %s2996_s14, 1  ;;  %p2997_p5 = scmp.ge.s32.totalorder %s3635_s12, 1 }
   0xb   : > { %p3734_p4 = por %p4332_p1, %p46_p0  ;;  %p256_p7 = scmp.lt.s32.totalorder %s3635_s12, 3 }
   0xc   : > { %p3739_p6 = por %p249_p3, %p46_p0  ;;  %s3637_s18 = smov [#allocation5]  }
   0xd   : > { %s4344_s15 = scalar_select %p3734_p4, 1, 0 }
   0xe   : > { %s4345_s16 = scalar_select %p3739_p6, 1, 0 }
   0xf   : > { %p3744_p8 = pnand %p2997_p5, %p256_p7  ;;  %s281_s19 = sshll.u32 %s3637_s18, 4  ;;  %s282_s19 = int_to_ptr.vmem [resolvable:$true] %s281_s19 }
  0x10   : > { %s3752_s20 = sadd.s32 1, %s3635_s12   ;;  %s33_s24 = sadd.s32 1, %s3631_s11 }
  0x11   : > { %s4346_s17 = scalar_select %p3744_p8, 1, 0 }
  0x12   : > { %p3402_p10 = pneg %p3744_p8  ;;  %s30_s22 = ssub.s32 %s3635_s12, %s3752_s20 }
  0x13   : > { %p3762_p12 = scmp.eq.s32.totalorder %s30_s22, 0  ;;  %s4349_s6 = sld [smem:[#allocation11_spill]] }
  0x14   : > { %p3756_p11 = pnand %p3402_p10, %p4332_p1 }
  0x15   : > { %s4348_s23 = scalar_select %p3762_p12, 1, 0 }
  0x16   : > { %p3509_p3 = pneg %p3756_p11 }
  0x19   : > { %s3507_s27 = scalar_lea.hbm %s4349_s6, 16 }
  0x1a   : > { %p3508_p0 = scmp.ne.s32.totalorder %s4349_s6, %s3507_s27  ;;  %p3514_p10 = scmp.lt.u32.totalorder %s3507_s27, %s4349_s6 }
  0x1c   : > { %p3510_p5 = pnand %p3509_p3, %p3508_p0 }
  0x1e   : > { %p3511_p7 = pneg %p3510_p5 }
  0x20   : > { %p3516_p9 = pnand %p3514_p10, %p3511_p7 }
  0x22   : > { %3519 = shalt.err (!%p3516_p9)
}
  0x23   : > { %s3520_s22 = scalar_lea.vmem %s282_s19, 16  ;;  %s3527_s25 = scalar_lea.vmem %s282_s19, 32 }
  0x24   : > { %p3521_p1 = scmp.ne.s32.totalorder %s282_s19, %s3520_s22  ;;  %p3528_p6 = scmp.lt.s32.totalorder %s282_s19, %s282_s19 }
  0x25   : > { %p3529_p4 = scmp.lt.s32.totalorder %s3527_s25, %s3520_s22 }
  0x26   : > { %p3523_p2 = pnand %p3521_p1, %p3509_p3 }
  0x27   : > { %p3530_p8 = por %p3529_p4, %p3528_p6 }
  0x28   : > { %p3524_p13 = pneg %p3523_p2 }
  0x2a   : > { %p3531_p12 = pnand %p3530_p8, %p3524_p13 }
  0x2c   : > { %3534 = shalt.err (!%p3531_p12)
}
  0x2d   : > { %3405 = dma.hbm_to_vmem [thread:$0]  (!%p3756_p11), %s4349_s6, 16, %s282_s19, [#allocation6]  }
  0x2e   : > { %p4350_p1 = scmp.ne.s32.totalorder %s4348_s23, 0  ;;  %p41_p2 = scmp.eq.s32.totalorder %s3635_s12, 0 }
  0x2f   : > { %p4351_p4 = scmp.ne.s32.totalorder %s3631_s11, %s3627_s10  ;;  %p4352_p6 = scmp.eq.s32.totalorder %s3725_s13, 1 }
  0x30   : > { %s3788_s27 = scalar_select %p4350_p1, %s3631_s11, %s33_s24  }
  0x31   : > { %p3796_p8 = por %p4352_p6, %p4351_p4  ;;  %p3415_p9 = scmp.lt.s32.totalorder %s3635_s12, 2 }
  0x32   : > { %s298_s29 = sand.u32 1, %s3631_s11   ;;  %p4354_p12 = pmov %p4351_p4 }
  0x33   : > { %s3000_s14 = sshll.u32 %s298_s29, 3  ;;  %s3001_s18 = sshll.u32 %s3635_s12, 7 }
  0x34   : > { %p42_p13 = por %p41_p2, %p4354_p12  ;;  %s3809_s19 = scalar_lea.hbm %s4322_s0, %s3001_s18 }
  0x35   : > { %s302_s23 = scalar_lea.vmem [#allocation2], %s3000_s14  ;;  %s299_s28 = scalar_lea.sflag [#allocation3], %s298_s29 }
  0x36   : > { %s309_s24 = sshll.u32 %s302_s23, 4  ;;  %p3811_p11 = pnand %p3415_p9, %p42_p13  ;;  %s3815_s24 = int_to_ptr.vmem [resolvable:$true] %s309_s24 }
  0x37   : > { %s3535_s6 = scalar_lea.hbm %s3809_s19, 128  ;;  %s3540_s22 = scalar_lea.hbm %s4322_s0, 256 }
  0x38   : > { %p3536_p0 = scmp.ne.s32.totalorder %s3809_s19, %s3535_s6  ;;  %p3537_p3 = pneg %p3811_p11 }
  0x39   : > { %p3541_p10 = scmp.lt.u32.totalorder %s3809_s19, %s4322_s0  ;;  %p3542_p1 = scmp.lt.u32.totalorder %s3540_s22, %s3535_s6 }
  0x3a   : > { %p3538_p5 = pnand %p3537_p3, %p3536_p0  ;;  %p3544_p4 = scmp.lt.u32.totalorder %s3535_s6, %s3809_s19 }
  0x3b   : > { %p3543_p2 = por %p3542_p1, %p3541_p10 }
  0x3c   : > { %p3539_p7 = pneg %p3538_p5 }
  0x3d   : > { %p3545_p6 = por %p3544_p4, %p3543_p2 }
  0x3f   : > { %p3546_p9 = pnand %p3545_p6, %p3539_p7 }
  0x41   : > { %3549 = shalt.err (!%p3546_p9)
}
  0x42   : > { %s3550_s29 = scalar_lea.vmem %s3815_s24, 128  ;;  %s3638_s18 = smov [#allocation2]  }
  0x43   : > { %p3551_p12 = scmp.ne.s32.totalorder %s3815_s24, %s3550_s29  ;;  %s3555_s14 = sshll.u32 %s3638_s18, 4  ;;  %s3556_s14 = int_to_ptr.vmem [resolvable:$false] %s3555_s14 }
  0x44   : > { %s3557_s25 = scalar_lea.vmem %s3556_s14, 256  ;;  %p3558_p5 = scmp.lt.s32.totalorder %s3815_s24, %s3556_s14 }
  0x45   : > { %p3553_p13 = pnand %p3551_p12, %p3537_p3  ;;  %p3559_p10 = scmp.lt.s32.totalorder %s3557_s25, %s3550_s29 }
  0x47   : > { %p3554_p0 = pneg %p3553_p13  ;;  %p3560_p1 = por %p3559_p10, %p3558_p5 }
  0x49   : > { %p3561_p2 = pnand %p3560_p1, %p3554_p0 }
  0x4b   : > { %3564 = shalt.err (!%p3561_p2)
}
  0x4c   : > { %3409 = dma.hbm_to_vmem [thread:$0]  (!%p3811_p11), %s3809_s19, 128, %s3815_s24, %s299_s28  }
  0x4d   : > { %p4356_p7 = scmp.ne.s32.totalorder %s4346_s17, 0 }
  0x4e   : > { %s3845_s6 = sand.u32 (!%p4356_p7), 1, %s3627_s10   ;;  %p4357_p3 = scmp.ne.s32.totalorder (!%p4356_p7), %s4344_s15, 0 }
  0x4f   : > { %324 = sbr.rel (%p4356_p7) target bundleno = 7674 (0x1dfa), region = 56  ;;  %s4335_s22 = sshll.u32 (!%p4356_p7), %s3845_s6, 3 }
  0x50   : > { %s327_s23 = scalar_lea.sflag (!%p4356_p7), [#allocation3], %s3845_s6  ;;  %s330_s29 = scalar_lea.vmem (!%p4356_p7), [#allocation2], %s4335_s22 }
  0x56   : > { %3610 = dma.done.wait (%p4357_p3), %s327_s23, 128  }
  0x57   : > { %3612 = vsyncadd (%p4357_p3), %s327_s23, 4294967168  ;;  %p4358_p11 = scmp.eq.s32.totalorder %s3725_s13, 0 }
  0x59   : > { %3614 = dma.done.wait (%p4358_p11), [#allocation6], 16   ;;  %p4359_p4 = pmov %p4358_p11 }
  0x5a   : > { %vm409_vm0 = vcmask 261120   ;;  %v3859_v0 = vld [vmem:[%s330_s29] sm:$0xff]  ;;  %v381_v9 = vld [vmem:[%s4324_s2 + $0x10] sm:$0xff]  ;;  %v3639_v10 = vmov 0.0|0.0   ;;  %v382_v12 = vld [vmem:[%s4324_s2 + $0x18] sm:$0xff]  ;;  %vm3640_vm1 = vmmov 0   ;;  %v514_v31 = vlaneseq }
  0x5b   : > { %3616 = vsyncadd (%p4359_p4), [#allocation6], 4294967280  ;;  %v410_v1 = vsel %vm409_vm0, %v3859_v0, 0.0  ;;  %v379_v7 = vld [vmem:[%s4324_s2] sm:$0xff]  ;;  %v380_v8 = vld [vmem:[%s4324_s2 + $0x8] sm:$0xff]  ;;  %3346 = vmatprep.subr.bf16.mxu0 %v3639_v10  ;;  %v3641_v13 = vmov 0.0   ;;  %v3886_v14 = vpack.c.bf16 %v382_v12, %v381_v9 }
  0x5c   : > { %411 = vadd.xlane.f32.xlu0 %v410_v1  ;;  %v3875_v11 = vpack.c.bf16 %v380_v8, %v379_v7  ;;  %3152 = vmatprep.mubr.msk.f32.mxu0 %vm3640_vm1, %v3641_v13  ;;  %v3894_v19 = vld [vmem:[%s4330_s8 + $0x1] ss:$0 sm:$0xff]  ;;  %v3899_v21 = vld [vmem:[%s4330_s8 + $0x2] ss:$0 sm:$0xff]  ;;  %v3909_v24 = vld [vmem:[%s4325_s3] ss:$0 sm:$0xff] }
  0x5d   : > { %3160 = vmatprep.subr.mxu1 %v3641_v13  ;;  %3162 = vmatprep.mubr.msk.f32.mxu1 %vm3640_vm1, %v3641_v13  ;;  %s3642_s24 = smov 120   ;;  %s3643_s26 = smov 96   ;;  %vm522_vm2 = vcmask 64512   ;;  %v515_v33 = vshrl.u32 %v514_v31, 7  ;;  %v3956_v55 = vld [vmem:[%s4326_s4 + $0x8] sm:$0xff]  ;;  %v3971_v1 = vld [vmem:[%s4326_s4] sm:$0xff] }
  0x5e   : > { %3348 = vmatpush3.bf16.msra.mxu0 %v3875_v11  ;;  %s3644_s28 = smov 88   ;;  %p372_p6 = scmp.lt.s32.totalorder %s3725_s13, 1  ;;  %vm1582_vm4 = vcmask 523264  }
  0x5f   : > { %3349 = vmatprep.subr.bf16.mxu0 %v3639_v10  ;;  %v516_v34 = vsub.s32 0, %v515_v33  ;;  %s3645_s29 = smov 56   ;;  %s4341_s15 = smov 64  }
  0x60   : > { %s373_s18 = scalar_select %p372_p6, %s3725_s13, 1 }
  0x61   : > { %s4342_s17 = smov 80   ;;  %s4340_s19 = smov 112  }
  0x62   : > { %3351 = vmatpush3.bf16.msra.mxu0 %v3886_v14  ;;  %s374_s23 = scalar_lea.vmem %s4323_s1, %s373_s18  ;;  %s4336_s18 = smov 48  }
  0x63   : > { %3155 = vmatprep.subr.mxu0 %v3641_v13  ;;  %v376_v32 = vld [vmem:[%s374_s23] sm:$0x1]  ;;  %s4338_s14 = smov 104   ;;  %s4339_s25 = smov 72  }
  0x64   : > { %vm377_vm3 = vcmp.eq.f32.partialorder %v376_v32, 0.0  ;;  %s4337_s22 = smov 40  }
  0x65   : > { %v378_v35 = vsel %vm377_vm3, -1e+09, %v3641_v13 }
  0x66   : > { %v3937_v36 = vrot.slane %v378_v35, %v516_v34 }
  0xe9   : > { %v412_v2 = vpop.xlane.xlu0 %411 }
  0xea   : > { %v414_v3 = vmul.f32 0.03125, %v412_v2 }
  0xec   : > { %v415_v4 = vsub.f32 %v3859_v0, %v414_v3 }
  0xee   : > { %v416_v5 = vmul.f32 %v415_v4, %v415_v4 }
  0xf0   : > { %v417_v6 = vsel %vm409_vm0, %v416_v5, 0.0 }
  0xf1   : > { %418 = vadd.xlane.f32.xlu0 %v417_v6 }
 0x17e   : > { %v419_v15 = vpop.xlane.xlu0 %418 }
 0x17f   : > { %v420_v16 = vmul.f32 0.03125, %v419_v15 }
 0x181   : > { %v421_v17 = vadd.f32 1e-05, %v420_v16 }
 0x183   : > { %3465 = vrsqrt.f32 %v421_v17 }
 0x18d   : > { %v3466_v18 = vpop.eup %3465 }
 0x18e   : > { %v423_v20 = vmul.f32 %v3466_v18, %v415_v4 }
 0x190   : > { %v428_v22 = vmul.f32 %v3894_v19, %v423_v20 }
 0x192   : > { %v433_v23 = vadd.f32 %v3899_v21, %v428_v22 }
 0x194   : > { %3153 = vmatmul.mubr.msk.f32.vlgmr.msra.gmra.mrb[0].mxu0 %vm409_vm0, %v433_v23 }
 0x195   : > { %3157 = vmatprep.mubr.msk.f32.mxu0 %vm3640_vm1, %v3641_v13 }
 0x267   : > { %v509_v25 = vpop.f32.mrb[0].mxu0 }
 0x268   : > { %v3912_v26 = vadd.f32 %v3909_v24, %v509_v25  ;;  %v3154_v27 = vpop.f32.mrb[1].mxu0 }
 0x26a   : > { %684 = vrot.lane.b32.xlu0 %v3912_v26, %s3642_s24  ;;  %520 = vrot.lane.b32.xlu1 %v3912_v26, %s3643_s26 }
 0x26e   : > { %686 = vrot.lane.b32.xlu1 %v3912_v26, %s3644_s28 }
 0x2dc   : > { %v521_v28 = vpop.permute.xlu1 %520  ;;  %v685_v30 = vpop.permute.xlu0 %684 }
 0x2dd   : > { %3156 = vmatpush3.xpose.msk.msra.mxu0 %vm522_vm2, %v521_v28 }
 0x2de   : > { %3165 = vmatprep.subr.mxu0 %v3641_v13 }
 0x2e0   : > { %3158 = vmatmul.mubr.msk.f32.vlgmr.msra.gmra.mrb[2].mxu0 %vm522_vm2, %v3912_v26  ;;  %v687_v29 = vpop.permute.xlu1 %686 }
 0x2e1   : > { %3166 = vmatpush3.xpose.msk.msra.mxu0 %vm522_vm2, %v687_v29  ;;  %3167 = vmatprep.mubr.msk.f32.mxu0 %vm3640_vm1, %v3641_v13 }
 0x2e2   : > { %3175 = vmatprep.subr.mxu0 %v3641_v13 }
 0x2e4   : > { %3168 = vmatmul.mubr.msk.f32.vlgmr.msra.gmra.mrb[4].mxu0 %vm522_vm2, %v685_v30 }
 0x2e5   : > { %3177 = vmatprep.mubr.msk.f32.mxu0 %vm3640_vm1, %v3641_v13  ;;  %3176 = vmatpush3.msra.mxu0 %v3956_v55 }
 0x2e6   : > { %3185 = vmatprep.subr.mxu0 %v3641_v13 }
 0x3b3   : > { %v593_v37 = vpop.f32.mrb[2].mxu0 }
 0x3b4   : > { %v594_v38 = vadd.f32 %v593_v37, %v3937_v36  ;;  %v3159_v39 = vpop.f32.mrb[3].mxu0  ;;  %v4007_v37 = vld [vmem:[%s4326_s4 + $0x10] sm:$0xff] }
 0x3b6   : > { %v597_v40 = vsel %vm522_vm2, %v594_v38, -inf }
 0x3b7   : > { %598 = vmax.xlane.f32.xlu1 %v597_v40  ;;  %v758_v41 = vpop.f32.mrb[4].mxu0 }
 0x3b8   : > { %v759_v42 = vadd.f32 %v758_v41, %v3937_v36  ;;  %v3169_v43 = vpop.f32.mrb[5].mxu0 }
 0x3ba   : > { %v762_v44 = vsel %vm522_vm2, %v759_v42, -inf }
 0x3bb   : > { %763 = vmax.xlane.f32.xlu0 %v762_v44 }
 0x3d1   : > { %773 = vrot.lane.b32.xlu0 %v3912_v26, %s3645_s29 }
 0x444   : > { %v599_v45 = vpop.xlane.xlu1 %598 }
 0x445   : > { %v600_v46 = vsub.f32 %v594_v38, %v599_v45 }
 0x447   : > { %v601_v47 = vmul.f32 1.442695, %v600_v46 }
 0x448   : > { %v764_v48 = vpop.xlane.xlu0 %763 }
 0x449   : > { %3467 = vpow2.f32 %v601_v47  ;;  %v765_v49 = vsub.f32 %v759_v42, %v764_v48 }
 0x44b   : > { %v766_v50 = vmul.f32 1.442695, %v765_v49  ;;  %v4022_v49 = vld [vmem:[%s4326_s4 + $0x18] sm:$0xff] }
 0x44c   : > { %v774_v61 = vpop.permute.xlu0 %773 }
 0x44d   : > { %3469 = vpow2.f32 %v766_v50 }
 0x453   : > { %v3468_v51 = vpop.eup %3467 }
 0x454   : > { %v603_v52 = vsel %vm522_vm2, %v3468_v51, 0.0 }
 0x455   : > { %604 = vadd.xlane.f32.xlu1 %v603_v52 }
 0x457   : > { %v3470_v53 = vpop.eup %3469 }
 0x458   : > { %v768_v54 = vsel %vm522_vm2, %v3470_v53, 0.0 }
 0x459   : > { %769 = vadd.xlane.f32.xlu1 %v768_v54 }
 0x46a   : > { %608 = vrot.lane.b32.xlu1 %v3912_v26, %s4341_s15  ;;  %s4364_s15 = smov 104  }
 0x46e   : > { %997 = vrot.lane.b32.xlu1 %v3912_v26, %s4342_s17  ;;  %s4365_s17 = smov 48  }
 0x472   : > { %995 = vrot.lane.b32.xlu1 %v3912_v26, %s4340_s19 }
 0x4e2   : > { %v605_v56 = vpop.xlane.xlu1 %604 }
 0x4e3   : > { %3471 = vrcp.f32 %v605_v56 }
 0x4e6   : > { %v770_v57 = vpop.xlane.xlu1 %769 }
 0x4e7   : > { %3473 = vrcp.f32 %v770_v57 }
 0x4ea   : > { %v609_v58 = vpop.permute.xlu1 %608 }
 0x4eb   : > { %3161 = vmatpush3.msra.mxu1 %v609_v58 }
 0x4ec   : > { %3170 = vmatprep.subr.mxu1 %v3641_v13 }
 0x4ed   : > { %v3472_v59 = vpop.eup %3471 }
 0x4ee   : > { %v607_v60 = vmul.f32 %v3472_v59, %v3468_v51  ;;  %v998_v4 = vpop.permute.xlu1 %997 }
 0x4f0   : > { %3163 = vmatmul.mubr.msk.f32.vlgmr.msra.gmra.mrb[0].mxu1 %vm522_vm2, %v607_v60 }
 0x4f1   : > { %v3474_v62 = vpop.eup %3473  ;;  %3171 = vmatpush3.msra.mxu1 %v774_v61  ;;  %3172 = vmatprep.mubr.msk.f32.mxu1 %vm3640_vm1, %v3641_v13 }
 0x4f2   : > { %v772_v63 = vmul.f32 %v3474_v62, %v3470_v53  ;;  %3180 = vmatprep.subr.mxu1 %v3641_v13  ;;  %v996_v7 = vpop.permute.xlu1 %995  ;;  %v4036_v62 = vld [vmem:[%s4330_s8] ss:$0 sm:$0xff] }
 0x4f4   : > { %3173 = vmatmul.mubr.msk.f32.vlgmr.msra.gmra.mrb[2].mxu1 %vm522_vm2, %v772_v63 }
 0x4f5   : > { %3182 = vmatprep.mubr.msk.f32.mxu1 %vm3640_vm1, %v3641_v13  ;;  %3181 = vmatpush3.msra.mxu1 %v3971_v1 }
 0x4f6   : > { %3190 = vmatprep.subr.mxu1 %v3641_v13 }
 0x5c3   : > { %v680_v2 = vpop.f32.mrb[0].mxu1 }
 0x5c4   : > { %v3164_v3 = vpop.f32.mrb[1].mxu1  ;;  %3183 = vmatmul.mubr.msk.f32.vlgmr.msra.gmra.mrb[4].mxu1 %vm522_vm2, %v680_v2 }
 0x5c5   : > { %3192 = vmatprep.mubr.msk.f32.mxu1 %vm3640_vm1, %v3641_v13 }
 0x5c7   : > { %v845_v5 = vpop.f32.mrb[2].mxu1 }
 0x5c8   : > { %v3174_v6 = vpop.f32.mrb[3].mxu1  ;;  %3178 = vmatmul.mubr.msk.f32.vlgmr.msra.gmra.mrb[6].mxu0 %vm522_vm2, %v845_v5 }
 0x5c9   : > { %3186 = vmatpush3.xpose.msk.msra.mxu0 %vm522_vm2, %v998_v4  ;;  %3187 = vmatprep.mubr.msk.f32.mxu0 %vm3640_vm1, %v3641_v13 }
 0x5ca   : > { %3195 = vmatprep.subr.mxu0 %v3641_v13 }
 0x5cc   : > { %3188 = vmatmul.mubr.msk.f32.vlgmr.msra.gmra.mrb[8].mxu0 %vm522_vm2, %v996_v7 }
 0x5cd   : > { %3197 = vmatprep.mubr.msk.f32.mxu0 %vm3640_vm1, %v3641_v13  ;;  %3196 = vmatpush3.msra.mxu0 %v4007_v37 }
 0x5ce   : > { %3205 = vmatprep.subr.mxu0 %v3641_v13 }
 0x697   : > { %v991_v8 = vpop.f32.mrb[4].mxu1 }
 0x698   : > { %v3184_v9 = vpop.f32.mrb[5].mxu1 }
 0x699   : > { %v388_v9 = vld [vmem:[%s4327_s5] sm:$0xff] }
 0x69b   : > { %v918_v12 = vpop.f32.mrb[6].mxu0 }
 0x69c   : > { %v992_v15 = vadd.f32 %v991_v8, %v918_v12  ;;  %v3179_v16 = vpop.f32.mrb[7].mxu0 }
 0x69d   : > { %v391_v16 = vld [vmem:[%s4327_s5 + $0x18] sm:$0xff] }
 0x69f   : > { %v1069_v17 = vpop.f32.mrb[8].mxu0 }
 0x6a0   : > { %v1070_v18 = vadd.f32 %v1069_v17, %v3937_v36  ;;  %v3189_v20 = vpop.f32.mrb[9].mxu0 }
 0x6a1   : > { %v394_v20 = vld [vmem:[%s4329_s7 + $0x8] sm:$0xff] }
 0x6a2   : > { %v1073_v22 = vsel %vm522_vm2, %v1070_v18, -inf }
 0x6a3   : > { %1074 = vmax.xlane.f32.xlu1 %v1073_v22  ;;  %v395_v22 = vld [vmem:[%s4329_s7 + $0x10] sm:$0xff] }
 0x6b4   : > { %1084 = vrot.lane.b32.xlu1 %v3912_v26, %s4336_s18 }
 0x6b8   : > { %1234 = vrot.lane.b32.xlu1 %v3912_v26, %s4338_s14  ;;  %s4366_s14 = smov 40  }
 0x730   : > { %v1075_v23 = vpop.xlane.xlu1 %1074 }
 0x731   : > { %v1076_v25 = vsub.f32 %v1070_v18, %v1075_v23  ;;  %v393_v18 = vld [vmem:[%s4329_s7] sm:$0xff] }
 0x732   : > { %v4075_v23 = vpack.c.bf16 %v394_v20, %v393_v18 }
 0x733   : > { %v1077_v27 = vmul.f32 1.442695, %v1076_v25  ;;  %v396_v25 = vld [vmem:[%s4329_s7 + $0x18] sm:$0xff] }
 0x734   : > { %v1085_v28 = vpop.permute.xlu1 %1084 }
 0x735   : > { %3475 = vpow2.f32 %v1077_v27  ;;  %3191 = vmatpush3.msra.mxu1 %v1085_v28  ;;  %v4081_v27 = vpack.c.bf16 %v396_v25, %v395_v22  ;;  %v397_v28 = vld [vmem:[%s4329_s7 + $0x20] sm:$0xff] }
 0x736   : > { %3200 = vmatprep.subr.mxu1 %v3641_v13 }
 0x738   : > { %v1235_v35 = vpop.permute.xlu1 %1234 }
 0x73f   : > { %v3476_v29 = vpop.eup %3475 }
 0x740   : > { %v1079_v30 = vsel %vm522_vm2, %v3476_v29, 0.0 }
 0x741   : > { %1080 = vadd.xlane.f32.xlu0 %v1079_v30 }
 0x757   : > { %1236 = vrot.lane.b32.xlu0 %v3912_v26, %s4339_s25  ;;  %s3055_s25 = sshll.u32 %s3725_s13, 7  ;;  %s3653_s13 = smov [#allocation7]  }
 0x758   : > { %s3569_s18 = sshll.u32 %s3653_s13, 4  ;;  %s3570_s18 = int_to_ptr.vmem [resolvable:$false] %s3569_s18 }
 0x759   : > { %s3571_s23 = scalar_lea.vmem %s3570_s18, 256 }
 0x7ce   : > { %v1081_v31 = vpop.xlane.xlu0 %1080 }
 0x7cf   : > { %3477 = vrcp.f32 %v1081_v31 }
 0x7d2   : > { %v1237_v34 = vpop.permute.xlu0 %1236 }
 0x7d9   : > { %v3478_v32 = vpop.eup %3477 }
 0x7da   : > { %v1083_v33 = vmul.f32 %v3478_v32, %v3476_v29  ;;  %v398_v29 = vld [vmem:[%s4329_s7 + $0x28] sm:$0xff] }
 0x7db   : > { %v4091_v30 = vpack.c.bf16 %v398_v29, %v397_v28 }
 0x7dc   : > { %3193 = vmatmul.mubr.msk.f32.vlgmr.msra.gmra.mrb[6].mxu1 %vm522_vm2, %v1083_v33 }
 0x7dd   : > { %3201 = vmatpush3.xpose.msk.msra.mxu1 %vm522_vm2, %v1237_v34  ;;  %3202 = vmatprep.mubr.msk.f32.mxu1 %vm3640_vm1, %v3641_v13 }
 0x7de   : > { %3210 = vmatprep.subr.mxu1 %v3641_v13 }
 0x7e0   : > { %3203 = vmatmul.mubr.msk.f32.vlgmr.msra.gmra.mrb[8].mxu1 %vm522_vm2, %v1235_v35  ;;  %v4099_v35 = vld [vmem:[%s4330_s8 + $0x3] ss:$0 sm:$0xff] }
 0x7e1   : > { %3212 = vmatprep.mubr.msk.f32.mxu1 %vm3640_vm1, %v3641_v13  ;;  %3211 = vmatpush3.msra.mxu1 %v4022_v49 }
 0x7e2   : > { %3358 = vmatprep.subr.bf16.mxu1 %v3639_v10 }
 0x8af   : > { %v1156_v38 = vpop.f32.mrb[6].mxu1 }
 0x8b0   : > { %v3194_v39 = vpop.f32.mrb[7].mxu1  ;;  %3198 = vmatmul.mubr.msk.f32.vlgmr.msra.gmra.mrb[10].mxu0 %vm522_vm2, %v1156_v38 }
 0x8b1   : > { %3207 = vmatprep.mubr.msk.f32.mxu0 %vm3640_vm1, %v3641_v13  ;;  %v4104_v39 = vld [vmem:[%s4330_s8 + $0x4] ss:$0 sm:$0xff] }
 0x8b3   : > { %v1308_v40 = vpop.f32.mrb[8].mxu1 }
 0x8b4   : > { %v1309_v41 = vadd.f32 %v1308_v40, %v3937_v36  ;;  %v3204_v42 = vpop.f32.mrb[9].mxu1 }
 0x8b5   : > { %v399_v42 = vld [vmem:[%s4329_s7 + $0x30] sm:$0xff] }
 0x8b6   : > { %v1312_v43 = vsel %vm522_vm2, %v1309_v41, -inf }
 0x8b7   : > { %1313 = vmax.xlane.f32.xlu1 %v1312_v43  ;;  %v400_v43 = vld [vmem:[%s4329_s7 + $0x38] sm:$0xff] }
 0x944   : > { %v1314_v44 = vpop.xlane.xlu1 %1313 }
 0x945   : > { %v1315_v45 = vsub.f32 %v1309_v41, %v1314_v44  ;;  %v4121_v44 = vpack.c.bf16 %v400_v43, %v399_v42 }
 0x947   : > { %v1316_v46 = vmul.f32 1.442695, %v1315_v45 }
 0x949   : > { %3479 = vpow2.f32 %v1316_v46 }
 0x953   : > { %v3480_v47 = vpop.eup %3479 }
 0x954   : > { %v1318_v48 = vsel %vm522_vm2, %v3480_v47, 0.0 }
 0x955   : > { %1319 = vadd.xlane.f32.xlu0 %v1318_v48  ;;  %v4134_v48 = vld [vmem:[%s4330_s8 + $0x5] ss:$0 sm:$0xff] }
 0x96b   : > { %1323 = vrot.lane.b32.xlu0 %v3912_v26, %s4337_s22 }
 0x983   : > { %v1229_v50 = vpop.f32.mrb[10].mxu0 }
 0x984   : > { %v1233_v51 = vadd.f32 %v1229_v50, %v992_v15  ;;  %v3199_v52 = vpop.f32.mrb[11].mxu0  ;;  %v390_v15 = vld [vmem:[%s4327_s5 + $0x10] sm:$0xff] }
 0x985   : > { %v4062_v17 = vpack.c.bf16 %v391_v16, %v390_v15 }
 0x9e2   : > { %v1320_v53 = vpop.xlane.xlu0 %1319 }
 0x9e3   : > { %3481 = vrcp.f32 %v1320_v53 }
 0x9e6   : > { %v1324_v54 = vpop.permute.xlu0 %1323 }
 0x9e7   : > { %3206 = vmatpush3.msra.mxu0 %v1324_v54 }
 0x9e8   : > { %3352 = vmatprep.subr.bf16.mxu0 %v3639_v10 }
 0x9ed   : > { %v3482_v56 = vpop.eup %3481 }
 0x9ee   : > { %v1322_v26 = vmul.f32 %v3482_v56, %v3480_v47 }
 0x9f0   : > { %3208 = vmatmul.mubr.msk.f32.vlgmr.msra.gmra.mrb[12].mxu0 %vm522_vm2, %v1322_v26 }
 0x9f1   : > { %3223 = vmatprep.mubr.msk.f32.mxu0 %vm3640_vm1, %v3641_v13 }
 0xac3   : > { %v1395_v57 = vpop.f32.mrb[12].mxu0 }
 0xac4   : > { %v3209_v58 = vpop.f32.mrb[13].mxu0  ;;  %3213 = vmatmul.mubr.msk.f32.vlgmr.msra.gmra.mrb[10].mxu1 %vm522_vm2, %v1395_v57 }
 0xac5   : > { %3242 = vmatprep.mubr.msk.f32.mxu1 %vm3640_vm1, %v3641_v13  ;;  %3360 = vmatpush3.bf16.msra.mxu1 %v4075_v23 }
 0xac6   : > { %3361 = vmatprep.subr.bf16.mxu1 %v3639_v10 }
 0xac9   : > { %3363 = vmatpush3.bf16.msra.mxu1 %v4081_v27 }
 0xaca   : > { %3364 = vmatprep.subr.bf16.mxu1 %v3639_v10 }
 0xacd   : > { %3366 = vmatpush3.bf16.msra.mxu1 %v4091_v30 }
 0xace   : > { %3367 = vmatprep.subr.bf16.mxu1 %v3639_v10 }
 0xad1   : > { %3369 = vmatpush3.bf16.msra.mxu1 %v4121_v44 }
 0xad2   : > { %3261 = vmatprep.subr.mxu1 %v3641_v13 }
 0xb97   : > { %v1468_v59 = vpop.f32.mrb[10].mxu1 }
 0xb98   : > { %v1472_v60 = vadd.f32 %v1468_v59, %v1233_v51  ;;  %v3214_v61 = vpop.f32.mrb[11].mxu1 }
 0xb9a   : > { %v1473_v63 = vadd.f32 %v1472_v60, %v3859_v0  ;;  %v389_v0 = vld [vmem:[%s4327_s5 + $0x8] sm:$0xff] }
 0xb9b   : > { %v4052_v12 = vpack.c.bf16 %v389_v0, %v388_v9 }
 0xb9c   : > { %v4040_v2 = vadd.f32 %v4036_v62, %v1473_v63 }
 0xb9d   : > { %3354 = vmatpush3.bf16.msra.mxu0 %v4052_v12 }
 0xb9e   : > { %v1479_v3 = vsel %vm409_vm0, %v4040_v2, 0.0  ;;  %3355 = vmatprep.subr.bf16.mxu0 %v3639_v10 }
 0xb9f   : > { %1480 = vadd.xlane.f32.xlu1 %v1479_v3 }
 0xba1   : > { %3357 = vmatpush3.bf16.msra.mxu0 %v4062_v17 }
 0xba2   : > { %3370 = vmatprep.subr.bf16.mxu0 %v3639_v10 }
 0xc2c   : > { %v1481_v4 = vpop.xlane.xlu1 %1480 }
 0xc2d   : > { %v1482_v5 = vmul.f32 0.03125, %v1481_v4 }
 0xc2f   : > { %v1483_v6 = vsub.f32 %v4040_v2, %v1482_v5 }
 0xc31   : > { %v1484_v7 = vmul.f32 %v1483_v6, %v1483_v6 }
 0xc33   : > { %v1485_v8 = vsel %vm409_vm0, %v1484_v7, 0.0 }
 0xc34   : > { %1486 = vadd.xlane.f32.xlu1 %v1485_v8 }
 0xcc1   : > { %v1487_v31 = vpop.xlane.xlu1 %1486 }
 0xcc2   : > { %v1488_v32 = vmul.f32 0.03125, %v1487_v31 }
 0xcc4   : > { %v1489_v33 = vadd.f32 1e-05, %v1488_v32 }
 0xcc6   : > { %3483 = vrsqrt.f32 %v1489_v33 }
 0xcd0   : > { %v3484_v34 = vpop.eup %3483 }
 0xcd1   : > { %v1491_v38 = vmul.f32 %v3484_v34, %v1483_v6 }
 0xcd3   : > { %v1496_v40 = vmul.f32 %v4099_v35, %v1491_v38 }
 0xcd5   : > { %v1501_v41 = vadd.f32 %v4104_v39, %v1496_v40 }
 0xcd7   : > { %3224 = vmatmul.mubr.msk.f32.vlgmr.msra.gmra.mrb[14].mxu0 %vm409_vm0, %v1501_v41 }
 0xcd8   : > { %3372 = vmatpush3.bf16.msra.mxu0 %v3875_v11  ;;  %3253 = vmatprep.mubr.msk.f32.mxu0 %vm3640_vm1, %v3641_v13  ;;  %v4125_v11 = vld [vmem:[#allocation5] ss:$0 sm:$0xff] }
 0xcd9   : > { %3373 = vmatprep.subr.bf16.mxu0 %v3639_v10 }
 0xcdc   : > { %3375 = vmatpush3.bf16.msra.mxu0 %v3886_v14 }
 0xcdd   : > { %3256 = vmatprep.subr.mxu0 %v3641_v13 }
 0xdaa   : > { %v1577_v45 = vpop.f32.mrb[14].mxu0 }
 0xdab   : > { %v1578_v14 = vadd.f32 %v4125_v11, %v1577_v45  ;;  %v3225_v46 = vpop.f32.mrb[15].mxu0 }
 0xdad   : > { %v1581_v47 = vmax.f32 %v1578_v14, 0.0 }
 0xdaf   : > { %3243 = vmatmul.mubr.msk.f32.vlgmr.msra.gmra.mrb[12].mxu1 %vm1582_vm4, %v1581_v47 }
 0xdb0   : > { %3263 = vmatprep.mubr.msk.f32.mxu1 %vm3640_vm1, %v3641_v13 }
 0xe82   : > { %v1652_v50 = vpop.f32.mrb[12].mxu1 }
 0xe83   : > { %v1656_v51 = vadd.f32 %v1652_v50, %v4040_v2  ;;  %v3244_v52 = vpop.f32.mrb[13].mxu1 }
 0xe85   : > { %v4138_v53 = vadd.f32 %v4134_v48, %v1656_v51 }
 0xe87   : > { %v1662_v54 = vsel %vm409_vm0, %v4138_v53, 0.0 }
 0xe88   : > { %1663 = vadd.xlane.f32.xlu1 %v1662_v54 }
 0xf15   : > { %v1664_v56 = vpop.xlane.xlu1 %1663 }
 0xf16   : > { %v1665_v26 = vmul.f32 0.03125, %v1664_v56 }
 0xf18   : > { %v1666_v57 = vsub.f32 %v4138_v53, %v1665_v26 }
 0xf1a   : > { %v1667_v58 = vmul.f32 %v1666_v57, %v1666_v57 }
 0xf1c   : > { %v1668_v59 = vsel %vm409_vm0, %v1667_v58, 0.0 }
 0xf1d   : > { %1669 = vadd.xlane.f32.xlu1 %v1668_v59 }
 0xfaa   : > { %v1670_v60 = vpop.xlane.xlu1 %1669 }
 0xfab   : > { %v1671_v61 = vmul.f32 0.03125, %v1670_v60 }
 0xfad   : > { %v1672_v63 = vadd.f32 1e-05, %v1671_v61 }
 0xfaf   : > { %3485 = vrsqrt.f32 %v1672_v63 }
 0xfb9   : > { %v3486_v2 = vpop.eup %3485 }
 0xfba   : > { %v1674_v3 = vmul.f32 %v3486_v2, %v1666_v57 }
 0xfbc   : > { %v1675_v4 = vmul.f32 %v3894_v19, %v1674_v3 }
 0xfbe   : > { %v1676_v5 = vadd.f32 %v3899_v21, %v1675_v4 }
 0xfc0   : > { %3254 = vmatmul.mubr.msk.f32.vlgmr.msra.gmra.mrb[16].mxu0 %vm409_vm0, %v1676_v5 }
 0xfc1   : > { %3258 = vmatprep.mubr.msk.f32.mxu0 %vm3640_vm1, %v3641_v13 }
0x1093   : > { %v1746_v6 = vpop.f32.mrb[16].mxu0 }
0x1094   : > { %v4150_v7 = vadd.f32 %v3909_v24, %v1746_v6  ;;  %v3255_v8 = vpop.f32.mrb[17].mxu0 }
0x1096   : > { %1916 = vrot.lane.b32.xlu0 %v4150_v7, %s3644_s28  ;;  %1751 = vrot.lane.b32.xlu1 %v4150_v7, %s3643_s26  ;;  %s4361_s26 = smov 64   ;;  %s4362_s28 = smov 112  }
0x109a   : > { %1914 = vrot.lane.b32.xlu0 %v4150_v7, %s3642_s24  ;;  %s4360_s24 = smov 80  }
0x1108   : > { %v1752_v19 = vpop.permute.xlu1 %1751  ;;  %v1917_v21 = vpop.permute.xlu0 %1916 }
0x1109   : > { %3257 = vmatpush3.xpose.msk.msra.mxu0 %vm522_vm2, %v1752_v19 }
0x110a   : > { %3266 = vmatprep.subr.mxu0 %v3641_v13 }
0x110c   : > { %3259 = vmatmul.mubr.msk.f32.vlgmr.msra.gmra.mrb[18].mxu0 %vm522_vm2, %v4150_v7  ;;  %v1915_v24 = vpop.permute.xlu0 %1914 }
0x110d   : > { %3267 = vmatpush3.xpose.msk.msra.mxu0 %vm522_vm2, %v1917_v21  ;;  %3268 = vmatprep.mubr.msk.f32.mxu0 %vm3640_vm1, %v3641_v13 }
0x110e   : > { %3276 = vmatprep.subr.mxu0 %v3641_v13 }
0x1110   : > { %3269 = vmatmul.mubr.msk.f32.vlgmr.msra.gmra.mrb[20].mxu0 %vm522_vm2, %v1915_v24 }
0x1111   : > { %3277 = vmatpush3.msra.mxu0 %v3956_v55  ;;  %3278 = vmatprep.mubr.msk.f32.mxu0 %vm3640_vm1, %v3641_v13 }
0x1112   : > { %3286 = vmatprep.subr.mxu0 %v3641_v13 }
0x11df   : > { %v1823_v9 = vpop.f32.mrb[18].mxu0 }
0x11e0   : > { %v1824_v0 = vadd.f32 %v1823_v9, %v3937_v36  ;;  %v3260_v15 = vpop.f32.mrb[19].mxu0 }
0x11e2   : > { %v1827_v16 = vsel %vm522_vm2, %v1824_v0, -inf }
0x11e3   : > { %1828 = vmax.xlane.f32.xlu0 %v1827_v16  ;;  %v1988_v18 = vpop.f32.mrb[20].mxu0 }
0x11e4   : > { %v1989_v20 = vadd.f32 %v1988_v18, %v3937_v36  ;;  %v3270_v22 = vpop.f32.mrb[21].mxu0 }
0x11e6   : > { %v1992_v25 = vsel %vm522_vm2, %v1989_v20, -inf }
0x11e7   : > { %1993 = vmax.xlane.f32.xlu1 %v1992_v25 }
0x11f8   : > { %2003 = vrot.lane.b32.xlu1 %v4150_v7, %s3645_s29  ;;  %s4363_s29 = smov 72  }
0x11fc   : > { %2227 = vrot.lane.b32.xlu1 %v4150_v7, %s4360_s24  ;;  %s4367_s24 = sshll.u32 %s3845_s6, 3 }
0x1270   : > { %v1829_v55 = vpop.xlane.xlu0 %1828 }
0x1271   : > { %v1830_v28 = vsub.f32 %v1824_v0, %v1829_v55 }
0x1273   : > { %v1831_v29 = vmul.f32 1.442695, %v1830_v28 }
0x1274   : > { %v1994_v31 = vpop.xlane.xlu1 %1993 }
0x1275   : > { %3487 = vpow2.f32 %v1831_v29  ;;  %v1995_v32 = vsub.f32 %v1989_v20, %v1994_v31 }
0x1277   : > { %v1996_v33 = vmul.f32 1.442695, %v1995_v32 }
0x1278   : > { %v2004_v47 = vpop.permute.xlu1 %2003 }
0x1279   : > { %3489 = vpow2.f32 %v1996_v33 }
0x127c   : > { %v2228_v26 = vpop.permute.xlu1 %2227 }
0x127f   : > { %v3488_v34 = vpop.eup %3487 }
0x1280   : > { %v1833_v38 = vsel %vm522_vm2, %v3488_v34, 0.0 }
0x1281   : > { %1834 = vadd.xlane.f32.xlu0 %v1833_v38 }
0x1283   : > { %v3490_v40 = vpop.eup %3489 }
0x1284   : > { %v1998_v41 = vsel %vm522_vm2, %v3490_v40, 0.0 }
0x1285   : > { %1999 = vadd.xlane.f32.xlu0 %v1998_v41 }
0x129b   : > { %1838 = vrot.lane.b32.xlu0 %v4150_v7, %s4361_s26  ;;  %s371_s26 = scalar_lea.vmem [#allocation7], %s4367_s24 }
0x129f   : > { %2225 = vrot.lane.b32.xlu0 %v4150_v7, %s4362_s28  ;;  %s2907_s28 = sshll.u32 %s371_s26, 4  ;;  %s4279_s28 = int_to_ptr.vmem [resolvable:$true] %s2907_s28 }
0x12a0   : > { %s3565_s22 = scalar_lea.vmem %s4279_s28, 128  ;;  %p3572_p0 = scmp.lt.s32.totalorder %s4279_s28, %s3570_s18 }
0x12a1   : > { %p3566_p9 = scmp.ne.s32.totalorder %s4279_s28, %s3565_s22  ;;  %p3573_p5 = scmp.lt.s32.totalorder %s3571_s23, %s3565_s22 }
0x12a3   : > { %p3567_p12 = pnand %p3566_p9, %p3796_p8  ;;  %p3574_p10 = por %p3573_p5, %p3572_p0 }
0x12a5   : > { %p3568_p13 = pneg %p3567_p12 }
0x12a7   : > { %p3575_p1 = pnand %p3574_p10, %p3568_p13 }
0x130e   : > { %v1835_v42 = vpop.xlane.xlu0 %1834 }
0x130f   : > { %3491 = vrcp.f32 %v1835_v42 }
0x1312   : > { %v2000_v43 = vpop.xlane.xlu0 %1999 }
0x1313   : > { %3493 = vrcp.f32 %v2000_v43 }
0x1316   : > { %v1839_v45 = vpop.permute.xlu0 %1838 }
0x1317   : > { %3262 = vmatpush3.msra.mxu1 %v1839_v45 }
0x1318   : > { %3271 = vmatprep.subr.mxu1 %v3641_v13 }
0x1319   : > { %v3492_v14 = vpop.eup %3491 }
0x131a   : > { %v1837_v46 = vmul.f32 %v3492_v14, %v3488_v34 }
0x131c   : > { %3264 = vmatmul.mubr.msk.f32.vlgmr.msra.gmra.mrb[14].mxu1 %vm522_vm2, %v1837_v46 }
0x131d   : > { %v3494_v50 = vpop.eup %3493  ;;  %3272 = vmatpush3.msra.mxu1 %v2004_v47  ;;  %3273 = vmatprep.mubr.msk.f32.mxu1 %vm3640_vm1, %v3641_v13 }
0x131e   : > { %v2002_v51 = vmul.f32 %v3494_v50, %v3490_v40  ;;  %3281 = vmatprep.subr.mxu1 %v3641_v13 }
0x1320   : > { %3274 = vmatmul.mubr.msk.f32.vlgmr.msra.gmra.mrb[16].mxu1 %vm522_vm2, %v2002_v51 }
0x1321   : > { %3282 = vmatpush3.msra.mxu1 %v3971_v1  ;;  %3283 = vmatprep.mubr.msk.f32.mxu1 %vm3640_vm1, %v3641_v13  ;;  %v2226_v1 = vpop.permute.xlu0 %2225 }
0x1322   : > { %3291 = vmatprep.subr.mxu1 %v3641_v13 }
0x13ef   : > { %v1910_v52 = vpop.f32.mrb[14].mxu1 }
0x13f0   : > { %v3265_v54 = vpop.f32.mrb[15].mxu1  ;;  %3284 = vmatmul.mubr.msk.f32.vlgmr.msra.gmra.mrb[18].mxu1 %vm522_vm2, %v1910_v52 }
0x13f1   : > { %3293 = vmatprep.mubr.msk.f32.mxu1 %vm3640_vm1, %v3641_v13 }
0x13f3   : > { %v2075_v56 = vpop.f32.mrb[16].mxu1 }
0x13f4   : > { %v3275_v57 = vpop.f32.mrb[17].mxu1  ;;  %3279 = vmatmul.mubr.msk.f32.vlgmr.msra.gmra.mrb[22].mxu0 %vm522_vm2, %v2075_v56 }
0x13f5   : > { %3287 = vmatpush3.xpose.msk.msra.mxu0 %vm522_vm2, %v2228_v26  ;;  %3288 = vmatprep.mubr.msk.f32.mxu0 %vm3640_vm1, %v3641_v13 }
0x13f6   : > { %3296 = vmatprep.subr.mxu0 %v3641_v13 }
0x13f8   : > { %3289 = vmatmul.mubr.msk.f32.vlgmr.msra.gmra.mrb[24].mxu0 %vm522_vm2, %v2226_v1 }
0x13f9   : > { %3297 = vmatpush3.msra.mxu0 %v4007_v37  ;;  %3298 = vmatprep.mubr.msk.f32.mxu0 %vm3640_vm1, %v3641_v13 }
0x13fa   : > { %3306 = vmatprep.subr.mxu0 %v3641_v13 }
0x14c3   : > { %v2221_v58 = vpop.f32.mrb[18].mxu1 }
0x14c4   : > { %v3285_v59 = vpop.f32.mrb[19].mxu1 }
0x14c7   : > { %v2148_v60 = vpop.f32.mrb[22].mxu0 }
0x14c8   : > { %v2222_v61 = vadd.f32 %v2221_v58, %v2148_v60  ;;  %v3280_v63 = vpop.f32.mrb[23].mxu0 }
0x14cb   : > { %v2299_v2 = vpop.f32.mrb[24].mxu0 }
0x14cc   : > { %v2300_v3 = vadd.f32 %v2299_v2, %v3937_v36  ;;  %v3290_v4 = vpop.f32.mrb[25].mxu0 }
0x14ce   : > { %v2303_v5 = vsel %vm522_vm2, %v2300_v3, -inf }
0x14cf   : > { %2304 = vmax.xlane.f32.xlu1 %v2303_v5 }
0x14e0   : > { %2466 = vrot.lane.b32.xlu1 %v4150_v7, %s4363_s29 }
0x14e4   : > { %2464 = vrot.lane.b32.xlu1 %v4150_v7, %s4364_s15 }
0x155c   : > { %v2305_v37 = vpop.xlane.xlu1 %2304 }
0x155d   : > { %v2306_v6 = vsub.f32 %v2300_v3, %v2305_v37 }
0x155f   : > { %v2307_v8 = vmul.f32 1.442695, %v2306_v6 }
0x1560   : > { %v2467_v15 = vpop.permute.xlu1 %2466 }
0x1561   : > { %3495 = vpow2.f32 %v2307_v8 }
0x1564   : > { %v2465_v18 = vpop.permute.xlu1 %2464 }
0x156b   : > { %v3496_v19 = vpop.eup %3495 }
0x156c   : > { %v2309_v21 = vsel %vm522_vm2, %v3496_v19, 0.0 }
0x156d   : > { %2310 = vadd.xlane.f32.xlu0 %v2309_v21 }
0x1583   : > { %2314 = vrot.lane.b32.xlu0 %v4150_v7, %s4365_s17  ;;  %s4277_s17 = scalar_lea.hbm %s4331_s9, %s3055_s25 }
0x15fa   : > { %v2311_v24 = vpop.xlane.xlu0 %2310 }
0x15fb   : > { %3497 = vrcp.f32 %v2311_v24  ;;  %v3053_v24 = vld [vmem:[%s4330_s8 + $0x7] ss:$0 sm:$0xff] }
0x15fe   : > { %v2315_v9 = vpop.permute.xlu0 %2314 }
0x15ff   : > { %3292 = vmatpush3.msra.mxu1 %v2315_v9 }
0x1600   : > { %3301 = vmatprep.subr.mxu1 %v3641_v13 }
0x1605   : > { %v3498_v0 = vpop.eup %3497 }
0x1606   : > { %v2313_v16 = vmul.f32 %v3498_v0, %v3496_v19 }
0x1608   : > { %3294 = vmatmul.mubr.msk.f32.vlgmr.msra.gmra.mrb[20].mxu1 %vm522_vm2, %v2313_v16 }
0x1609   : > { %3302 = vmatpush3.xpose.msk.msra.mxu1 %vm522_vm2, %v2467_v15  ;;  %3303 = vmatprep.mubr.msk.f32.mxu1 %vm3640_vm1, %v3641_v13 }
0x160a   : > { %3311 = vmatprep.subr.mxu1 %v3641_v13 }
0x160c   : > { %3304 = vmatmul.mubr.msk.f32.vlgmr.msra.gmra.mrb[22].mxu1 %vm522_vm2, %v2465_v18 }
0x160d   : > { %3312 = vmatpush3.msra.mxu1 %v4022_v49  ;;  %3313 = vmatprep.mubr.msk.f32.mxu1 %vm3640_vm1, %v3641_v13 }
0x160e   : > { %3382 = vmatprep.subr.bf16.mxu1 %v3639_v10 }
0x16db   : > { %v2386_v20 = vpop.f32.mrb[20].mxu1 }
0x16dc   : > { %v3295_v22 = vpop.f32.mrb[21].mxu1  ;;  %3299 = vmatmul.mubr.msk.f32.vlgmr.msra.gmra.mrb[26].mxu0 %vm522_vm2, %v2386_v20 }
0x16dd   : > { %3308 = vmatprep.mubr.msk.f32.mxu0 %vm3640_vm1, %v3641_v13 }
0x16df   : > { %v2538_v25 = vpop.f32.mrb[22].mxu1 }
0x16e0   : > { %v2539_v55 = vadd.f32 %v2538_v25, %v3937_v36  ;;  %v3305_v28 = vpop.f32.mrb[23].mxu1 }
0x16e2   : > { %v2542_v29 = vsel %vm522_vm2, %v2539_v55, -inf }
0x16e3   : > { %2543 = vmax.xlane.f32.xlu0 %v2542_v29 }
0x16f9   : > { %2553 = vrot.lane.b32.xlu0 %v4150_v7, %s4366_s14  ;;  %s2894_s14 = scalar_lea.sflag [#allocation4], %s3845_s6 }
0x1770   : > { %v2544_v49 = vpop.xlane.xlu0 %2543 }
0x1771   : > { %v2545_v31 = vsub.f32 %v2539_v55, %v2544_v49 }
0x1773   : > { %v2546_v32 = vmul.f32 1.442695, %v2545_v31 }
0x1774   : > { %v2554_v33 = vpop.permute.xlu0 %2553 }
0x1775   : > { %3499 = vpow2.f32 %v2546_v32  ;;  %3307 = vmatpush3.msra.mxu0 %v2554_v33 }
0x1776   : > { %3376 = vmatprep.subr.bf16.mxu0 %v3639_v10 }
0x177f   : > { %v3500_v34 = vpop.eup %3499 }
0x1780   : > { %v2548_v38 = vsel %vm522_vm2, %v3500_v34, 0.0 }
0x1781   : > { %2549 = vadd.xlane.f32.xlu1 %v2548_v38 }
0x17af   : > { %v2459_v36 = vpop.f32.mrb[26].mxu0 }
0x17b0   : > { %v2463_v40 = vadd.f32 %v2459_v36, %v2222_v61  ;;  %v3300_v41 = vpop.f32.mrb[27].mxu0 }
0x180e   : > { %v2550_v42 = vpop.xlane.xlu1 %2549 }
0x180f   : > { %3501 = vrcp.f32 %v2550_v42 }
0x1819   : > { %v3502_v43 = vpop.eup %3501 }
0x181a   : > { %v2552_v45 = vmul.f32 %v3502_v43, %v3500_v34 }
0x181c   : > { %3309 = vmatmul.mubr.msk.f32.vlgmr.msra.gmra.mrb[28].mxu0 %vm522_vm2, %v2552_v45 }
0x181d   : > { %3378 = vmatpush3.bf16.msra.mxu0 %v4052_v12  ;;  %3324 = vmatprep.mubr.msk.f32.mxu0 %vm3640_vm1, %v3641_v13 }
0x181e   : > { %3379 = vmatprep.subr.bf16.mxu0 %v3639_v10 }
0x1821   : > { %3381 = vmatpush3.bf16.msra.mxu0 %v4062_v17 }
0x18ef   : > { %v2625_v7 = vpop.f32.mrb[28].mxu0 }
0x18f0   : > { %v3310_v14 = vpop.f32.mrb[29].mxu0  ;;  %3314 = vmatmul.mubr.msk.f32.vlgmr.msra.gmra.mrb[24].mxu1 %vm522_vm2, %v2625_v7 }
0x18f1   : > { %3384 = vmatpush3.bf16.msra.mxu1 %v4075_v23  ;;  %3343 = vmatprep.mubr.msk.f32.mxu1 %vm3640_vm1, %v3641_v13 }
0x18f2   : > { %3385 = vmatprep.subr.bf16.mxu1 %v3639_v10 }
0x18f5   : > { %3387 = vmatpush3.bf16.msra.mxu1 %v4081_v27 }
0x18f6   : > { %3388 = vmatprep.subr.bf16.mxu1 %v3639_v10 }
0x18f9   : > { %3390 = vmatpush3.bf16.msra.mxu1 %v4091_v30 }
0x18fa   : > { %3391 = vmatprep.subr.bf16.mxu1 %v3639_v10 }
0x18fd   : > { %3393 = vmatpush3.bf16.msra.mxu1 %v4121_v44 }
0x19c3   : > { %v2698_v12 = vpop.f32.mrb[24].mxu1 }
0x19c4   : > { %v2702_v17 = vadd.f32 %v2698_v12, %v2463_v40  ;;  %v3315_v46 = vpop.f32.mrb[25].mxu1 }
0x19c6   : > { %v2703_v23 = vadd.f32 %v2702_v17, %v4138_v53 }
0x19c8   : > { %v2704_v47 = vadd.f32 %v4036_v62, %v2703_v23 }
0x19ca   : > { %v2705_v13 = vsel %vm409_vm0, %v2704_v47, 0.0 }
0x19cb   : > { %2706 = vadd.xlane.f32.xlu1 %v2705_v13 }
0x1a58   : > { %v2707_v50 = vpop.xlane.xlu1 %2706 }
0x1a59   : > { %v2708_v27 = vmul.f32 0.03125, %v2707_v50 }
0x1a5b   : > { %v2709_v51 = vsub.f32 %v2704_v47, %v2708_v27 }
0x1a5d   : > { %v2710_v52 = vmul.f32 %v2709_v51, %v2709_v51 }
0x1a5f   : > { %v2711_v30 = vsel %vm409_vm0, %v2710_v52, 0.0 }
0x1a60   : > { %2712 = vadd.xlane.f32.xlu1 %v2711_v30 }
0x1aed   : > { %v2713_v10 = vpop.xlane.xlu1 %2712 }
0x1aee   : > { %v2714_v54 = vmul.f32 0.03125, %v2713_v10 }
0x1af0   : > { %v2715_v44 = vadd.f32 1e-05, %v2714_v54 }
0x1af2   : > { %3503 = vrsqrt.f32 %v2715_v44 }
0x1afc   : > { %v3504_v56 = vpop.eup %3503 }
0x1afd   : > { %v2717_v26 = vmul.f32 %v3504_v56, %v2709_v51 }
0x1aff   : > { %v2718_v53 = vmul.f32 %v4099_v35, %v2717_v26 }
0x1b01   : > { %v2719_v62 = vadd.f32 %v4104_v39, %v2718_v53 }
0x1b03   : > { %3325 = vmatmul.mubr.msk.f32.vlgmr.msra.gmra.mrb[30].mxu0 %vm409_vm0, %v2719_v62 }
0x1bd6   : > { %v2789_v57 = vpop.f32.mrb[30].mxu0 }
0x1bd7   : > { %v2790_v1 = vadd.f32 %v4125_v11, %v2789_v57  ;;  %v3326_v58 = vpop.f32.mrb[31].mxu0 }
0x1bd9   : > { %v2793_v59 = vmax.f32 %v2790_v1, 0.0 }
0x1bdb   : > { %3344 = vmatmul.mubr.msk.f32.vlgmr.msra.gmra.mrb[26].mxu1 %vm1582_vm4, %v2793_v59 }
0x1cae   : > { %v2863_v60 = vpop.f32.mrb[26].mxu1 }
0x1caf   : > { %v2867_v61 = vadd.f32 %v2863_v60, %v2704_v47  ;;  %v3345_v63 = vpop.f32.mrb[27].mxu1 }
0x1cb1   : > { %v2868_v2 = vadd.f32 %v4134_v48, %v2867_v61  ;;  %v3052_v48 = vld [vmem:[%s4330_s8 + $0x6] ss:$0 sm:$0xff] }
0x1cb3   : > { %v2869_v3 = vsel %vm409_vm0, %v2868_v2, 0.0 }
0x1cb4   : > { %2870 = vadd.xlane.f32.xlu1 %v2869_v3 }
0x1d41   : > { %v2871_v35 = vpop.xlane.xlu1 %2870 }
0x1d42   : > { %v2872_v39 = vmul.f32 0.03125, %v2871_v35 }
0x1d44   : > { %v2873_v4 = vsub.f32 %v2868_v2, %v2872_v39 }
0x1d46   : > { %v2874_v5 = vmul.f32 %v2873_v4, %v2873_v4 }
0x1d48   : > { %v2875_v11 = vsel %vm409_vm0, %v2874_v5, 0.0 }
0x1d49   : > { %2876 = vadd.xlane.f32.xlu1 %v2875_v11 }
0x1dd6   : > { %v2877_v37 = vpop.xlane.xlu1 %2876 }
0x1dd7   : > { %v2878_v6 = vmul.f32 0.03125, %v2877_v37 }
0x1dd9   : > { %v2879_v8 = vadd.f32 1e-05, %v2878_v6 }
0x1ddb   : > { %3505 = vrsqrt.f32 %v2879_v8 }
0x1de5   : > { %v3506_v19 = vpop.eup %3505 }
0x1de6   : > { %v2881_v21 = vmul.f32 %v3506_v19, %v2873_v4 }
0x1de8   : > { %v2886_v9 = vmul.f32 %v3052_v48, %v2881_v21 }
0x1dea   : > { %v2891_v0 = vadd.f32 %v3053_v24, %v2886_v9 }
0x1dec   : > { %2892 = vst.msk [vmem:[%s371_s26] sm:$0xff] %vm409_vm0, %v2891_v0 }
0x1ded   : > { %3578 = shalt.err (!%p3575_p1)
}
0x1dee   : > { %s3579_s6 = scalar_lea.hbm %s4277_s17, 128  ;;  %s3583_s24 = scalar_lea.hbm %s4331_s9, 256 }
0x1def   : > { %p3580_p2 = scmp.ne.s32.totalorder %s4277_s17, %s3579_s6  ;;  %p3584_p11 = scmp.lt.u32.totalorder %s4277_s17, %s4331_s9 }
0x1df0   : > { %p3585_p4 = scmp.lt.u32.totalorder %s3583_s24, %s3579_s6  ;;  %p3587_p9 = scmp.lt.u32.totalorder %s3579_s6, %s4277_s17 }
0x1df1   : > { %p3581_p7 = pnand %p3580_p2, %p3796_p8 }
0x1df2   : > { %p3586_p6 = por %p3585_p4, %p3584_p11 }
0x1df3   : > { %p3582_p3 = pneg %p3581_p7 }
0x1df4   : > { %p3588_p12 = por %p3587_p9, %p3586_p6 }
0x1df6   : > { %p3589_p13 = pnand %p3588_p12, %p3582_p3 }
0x1df8   : > { %3592 = shalt.err (!%p3589_p13)
}
0x1df9   : > { %3400 = dma.vmem_to_hbm [thread:$0]  (%p3796_p8), %s4279_s28, 128, %s4277_s17, %s2894_s14  }
0x1dfa PF: > { %s2919_s15 = sand.u32 1, %s3623_s30   ;;  %p4368_p0 = scmp.ne.s32.totalorder %s4345_s16, 0 }
0x1dfb   : > { %p4369_p5 = scmp.ge.s32.totalorder %s3635_s12, 2  ;;  %s2920_s22 = scalar_lea.sflag [#allocation4], %s2919_s15 }
0x1dfd   : > { %p3411_p10 = pnand %p4369_p5, %p4368_p0 }
0x1dff   : > { %3618 = dma.done.wait (!%p3411_p10), %s2920_s22, 128  }
0x1e00   : > { %3620 = vsyncadd (!%p3411_p10), %s2920_s22, 4294967168  ;;  %p23_p1 = scmp.ge.s32.totalorder %s3752_s20, 4   ;;  %s4370_s30 = smov %s3627_s10 }
0x1e01   : > { %s4371_s10 = smov %s3631_s11  ;;  %s4372_s11 = smov %s3788_s27 }
0x1e02   : > { %s4373_s12 = smov %s3752_s20  ;;  %25 = sbr.rel (!%p23_p1) target bundleno = 8 (0x8), region = 108 }
0x1e09   :  { %2925 = vsyncpa [#allocation3], 1 }
0x1e0a   :  { %2927 = vsyncpa [#allocation3 + $0x1], 1 }
0x1e0b   :  { %2928 = vsyncpa [#allocation6], 1 }
0x1e0c   :  { %2929 = vsyncpa [#allocation4], 1 }
0x1e0d   :  { %2931 = vsyncpa [#allocation4 + $0x1], 1 }

</bundles_post_ra>
